<compile_context>
chip_gen: v6e
topology: v6e:2x2x1
jax: 0.10.0
libtpu: 0.0.40
codegen_flags: <defaults>
</compile_context>

<pallas_src>
import functools
import math

import jax
import jax.numpy as jnp
import numpy as np
from jax.experimental import pallas as pl
from jax.experimental.pallas import tpu as pltpu


def _round_up(x, m):
    return ((x + m - 1) // m) * m


def _cdiv(a, b):
    return -(-a // b)


def _vmem_budget_bytes():
    """Per-generation VMEM limit: ~3/4 of physical per-core VMEM."""
    cap = 64 * 1024 * 1024                      # conservative fallback (v7x per-TC)
    try:
        info = pltpu.get_tpu_info()
        cap = int(getattr(info, "vmem_capacity_bytes", cap) or cap)
    except Exception:
        pass
    return max(32 * 1024 * 1024, min((cap * 3) // 4, 112 * 1024 * 1024))


# ----------------------------------------------------------------------------
# Pallas kernel: fused (polyphase tap gather -> wide-K matmul -> bias -> LN)
# ----------------------------------------------------------------------------
def _patch_embed_kernel(x_ref, w_ref, b_ref, g_ref, beta_ref, o_ref, *,
                        toh, wout_pad, cp, kqh, kqw, d_true, eps, merge_taps):
    # x_ref:    (HQ, WQ, Cp)    space-to-depth slab for batch b (compute dtype)
    # w_ref:    (K_eff, D_pad)  stacked per-tap weights (tap ti = rows ti*Cp..)
    # b_ref:    (1, D_pad)      conv bias       (f32, zero on padded lanes)
    # g_ref:    (1, D_pad)      LayerNorm gamma (f32, zero on padded lanes)
    # beta_ref: (1, D_pad)      LayerNorm beta  (f32, zero on padded lanes)
    # o_ref:    (TM, D_pad)     output row tile, TM = toh * wout_pad
    t = pl.program_id(1)
    row0 = t * toh
    tm = toh * wout_pad
    d_pad = o_ref.shape[-1]

    # One (sublane-misaligned) band read per qw (kqw reads, not kqh*kqw); the
    # per-qh selection is a free leading-dim slice of the already-loaded band.
    bands = [
        x_ref[pl.ds(row0, toh + kqh - 1), pl.ds(qw, wout_pad), :]
        for qw in range(kqw)
    ]
    slabs = []
    for qh in range(kqh):
        for qw in range(kqw):
            slabs.append(bands[qw][qh:qh + toh].reshape(tm, cp))

    if merge_taps or len(slabs) == 1:
        # Single wide-K MXU matmul; accumulation stays inside the MXU.
        lhs = slabs[0] if len(slabs) == 1 else jnp.concatenate(slabs, axis=-1)
        acc = jnp.dot(lhs, w_ref[...], preferred_element_type=jnp.float32)
    else:
        # Compile-safety fallback: per-tap dots with in-register accumulation.
        acc = jnp.zeros((tm, d_pad), jnp.float32)
        for ti, slab in enumerate(slabs):
            acc = acc + jnp.dot(slab, w_ref[ti * cp:(ti + 1) * cp, :],
                                preferred_element_type=jnp.float32)

    acc = acc + b_ref[...]                       # padded lanes stay exactly 0

    # LayerNorm over the true embedding width; sum-based statistics so the
    # zero padded lanes contribute nothing (torch-style biased variance).
    inv_d = 1.0 / d_true
    mean = jnp.sum(acc, axis=-1, keepdims=True) * inv_d
    msq = jnp.sum(acc * acc, axis=-1, keepdims=True) * inv_d
    var = jnp.maximum(msq - mean * mean, 0.0)
    normed = (acc - mean) * jax.lax.rsqrt(var + eps)
    o_ref[...] = (normed * g_ref[...] + beta_ref[...]).astype(o_ref.dtype)


# ----------------------------------------------------------------------------
# Wrapper: layout glue (no kh*kw inflation) + pallas_call
# ----------------------------------------------------------------------------
def overlap_patch_embed(x, weight, bias, gamma, beta, *, stride, eps=1e-5,
                        compute_dtype=jnp.bfloat16, out_dtype=jnp.float32,
                        tm_target=None):
    """x: (B, C, H, W) NCHW. weight: (D, C, kh, kw). Returns (B, L, D)."""
    B, C, H, W = x.shape
    D, _, kh, kw = weight.shape
    pad_h, pad_w = kh // 2, kw // 2

    Hp, Wp = H + 2 * pad_h, W + 2 * pad_w
    Hout = (Hp - kh) // stride + 1
    Wout = (Wp - kw) // stride + 1

    # Polyphase decomposition parameters.
    kqh, kqw = _cdiv(kh, stride), _cdiv(kw, stride)      # taps per spatial axis
    kh_pad, kw_pad = kqh * stride, kqw * stride          # kernel zero-padded
    cp = stride * stride * C                             # per-tap contraction
    k_eff = kqh * kqw * cp

    # Lane-dense embedding dimension (unmasked stores, full MXU N).
    d_pad = _round_up(D, 128)

    # Sublane packing of the compute dtype (8 for f32, 16 for bf16).
    itemsize = jnp.dtype(compute_dtype).itemsize
    sub = {4: 8, 2: 16, 1: 32}.get(itemsize, 8)

    vmem_limit = _vmem_budget_bytes()
    if tm_target is None:
        # Larger row tiles where VMEM allows (v5e/v6e: 128 MiB physical);
        # stay conservative on v7x (64 MiB per TC).
        tm_target = 1024 if vmem_limit >= 72 * 1024 * 1024 else 512

    wout_pad = _round_up(Wout, sub)
    toh = max(1, min(Hout, max(1, tm_target // wout_pad)))
    # Prefer TM a multiple of 256 (full MXU passes on v6e/v7x) when it does
    # not increase the amount of padded rows.
    if toh * wout_pad >= 256:
        per = 256 // math.gcd(256, wout_pad)
        toh_al = (toh // per) * per
        if per <= toh and _cdiv(Hout, toh_al) * toh_al <= _cdiv(Hout, toh) * toh:
            toh = toh_al
    n_tiles = _cdiv(Hout, toh)
    hout_pad = n_tiles * toh
    tm = toh * wout_pad

    hq = hout_pad + kqh - 1                              # space-to-depth extent
    wq = wout_pad + kqw - 1
    hsd, wsd = hq * stride, wq * stride

    # NCHW -> NHWC (cast first so the layout copies are half-width for bf16),
    # conv zero-padding + extend/crop to the space-to-depth grid, polyphase
    # rearrangement.  Same element count as the input — no kh*kw inflation.
    # TODO(synk): for very large images, stream (toh+kqh-1)-row bands from an
    # NHWC pl.ANY ref with manual DMAs instead of a VMEM-resident per-batch slab.
    x_nhwc = jnp.transpose(x, (0, 2, 3, 1)).astype(compute_dtype)
    x_p = jnp.pad(
        x_nhwc,
        ((0, 0),
         (pad_h, max(0, hsd - H - pad_h)),
         (pad_w, max(0, wsd - W - pad_w)),
         (0, 0)))[:, :hsd, :wsd, :]
    x_sd = (x_p.reshape(B, hq, stride, wq, stride, C)
            .transpose(0, 1, 3, 2, 4, 5)
            .reshape(B, hq, wq, cp))

    # Weight (D, C, kh, kw) -> (K_eff, D_pad); row order (qh, qw, rh, rw, c)
    # matches the in-kernel LHS tap order; zero-pad taps beyond kh/kw and
    # embedding lanes beyond D.
    w_p = jnp.pad(weight, ((0, 0), (0, 0), (0, kh_pad - kh), (0, kw_pad - kw)))
    w_mat = (w_p.reshape(D, C, kqh, stride, kqw, stride)
             .transpose(2, 4, 3, 5, 1, 0)
             .reshape(k_eff, D))
    w_mat = jnp.pad(w_mat, ((0, 0), (0, d_pad - D))).astype(compute_dtype)

    def _pad_lane(v):
        return jnp.pad(v.reshape(1, D).astype(jnp.float32),
                       ((0, 0), (0, d_pad - D)))

    b2, g2, be2 = _pad_lane(bias), _pad_lane(gamma), _pad_lane(beta)

    n_rows = hout_pad * wout_pad
    cost = pl.CostEstimate(
        flops=2 * B * n_rows * k_eff * d_pad,
        transcendentals=B * n_rows,                       # rsqrt per row
        bytes_accessed=(B * hq * wq * cp * itemsize
                        + k_eff * d_pad * itemsize
                        + B * n_rows * d_pad * jnp.dtype(out_dtype).itemsize))

    def _build(merge_taps):
        kernel = functools.partial(
            _patch_embed_kernel, toh=toh, wout_pad=wout_pad, cp=cp,
            kqh=kqh, kqw=kqw, d_true=D, eps=eps, merge_taps=merge_taps)
        return pl.pallas_call(
            kernel,
            out_shape=jax.ShapeDtypeStruct((B, n_rows, d_pad), out_dtype),
            grid=(B, n_tiles),
            in_specs=[
                # Per-batch space-to-depth slab; constant over the tile axis so
                # it is DMA'd once per batch element and reused by every tile.
                pl.BlockSpec((None, hq, wq, cp), lambda b, t: (b, 0, 0, 0)),
                # Weights / bias / LN params: VMEM-resident across the grid.
                pl.BlockSpec((k_eff, d_pad), lambda b, t: (0, 0)),
                pl.BlockSpec((1, d_pad), lambda b, t: (0, 0)),
                pl.BlockSpec((1, d_pad), lambda b, t: (0, 0)),
                pl.BlockSpec((1, d_pad), lambda b, t: (0, 0)),
            ],
            out_specs=pl.BlockSpec((None, tm, d_pad), lambda b, t: (b, t, 0)),
            compiler_params=pltpu.CompilerParams(
                dimension_semantics=("parallel", "parallel"),
                vmem_limit_bytes=vmem_limit),
            cost_estimate=cost,
        )

    try:
        out = _build(True)(x_sd, w_mat, b2, g2, be2)
    except Exception:
        # Portability fallback: per-tap accumulation (no lane-dim concat).
        out = _build(False)(x_sd, w_mat, b2, g2, be2)

    # Drop row / lane padding and flatten to (B, L, D).
    out = out.reshape(B, hout_pad, wout_pad, d_pad)[:, :Hout, :Wout, :D]
    return out.reshape(B, Hout * Wout, D)


# ----------------------------------------------------------------------------
# Pure-JAX reference (for the sanity check)
# ----------------------------------------------------------------------------
def _reference(x, weight, bias, gamma, beta, *, stride, eps=1e-5):
    pad = weight.shape[2] // 2
    y = jax.lax.conv_general_dilated(
        x, weight, window_strides=(stride, stride),
        padding=[(pad, pad), (pad, pad)],
        dimension_numbers=("NCHW", "OIHW", "NCHW"))
    y = y + bias[None, :, None, None]
    B, D, Ho, Wo = y.shape
    y = y.reshape(B, D, Ho * Wo).transpose(0, 2, 1)
    mean = jnp.mean(y, axis=-1, keepdims=True)
    var = jnp.mean((y - mean) ** 2, axis=-1, keepdims=True)
    return (y - mean) * jax.lax.rsqrt(var + eps) * gamma + beta


if __name__ == "__main__":
    def run_case(B, C, H, W, patch, stride, D, key):
        kx, kw_, kb, kg, kbe = jax.random.split(key, 5)
        x = jax.random.normal(kx, (B, C, H, W), jnp.float32)
        weight = jax.random.normal(kw_, (D, C, patch, patch), jnp.float32) * 0.05
        bias = jax.random.normal(kb, (D,), jnp.float32) * 0.1
        gamma = (jnp.ones((D,), jnp.float32)
                 + 0.1 * jax.random.normal(kg, (D,), jnp.float32))
        beta = 0.1 * jax.random.normal(kbe, (D,), jnp.float32)

        ref = _reference(x, weight, bias, gamma, beta, stride=stride)

        # Exact-math path (f32 everywhere) — tight tolerance.
        out_f32 = overlap_patch_embed(x, weight, bias, gamma, beta,
                                      stride=stride, compute_dtype=jnp.float32)
        out_f32 = jax.block_until_ready(out_f32)
        np.testing.assert_allclose(np.asarray(out_f32), np.asarray(ref),
                                   rtol=2e-3, atol=2e-3)

        # Performance-default path (bf16 matmul inputs, f32 accumulation / LN).
        out_bf16 = overlap_patch_embed(x, weight, bias, gamma, beta,
                                       stride=stride, compute_dtype=jnp.bfloat16)
        out_bf16 = jax.block_until_ready(out_bf16)
        np.testing.assert_allclose(np.asarray(out_bf16), np.asarray(ref),
                                   rtol=5e-2, atol=5e-2)

    key = jax.random.PRNGKey(0)
    k1, k2 = jax.random.split(key)
    # Stride divides the kernel (no zero-padded polyphase taps).
    run_case(B=2, C=4, H=16, W=16, patch=4, stride=2, D=32, key=k1)
    # SegFormer-style kernel (patch=7, stride=4): exercises the zero-padded
    # polyphase-tap path flagged in the correctness review.
    run_case(B=2, C=3, H=16, W=16, patch=7, stride=4, D=32, key=k2)
    print("KERNEL_OK")
</pallas_src>

<mosaic_0001>
module attributes {stable_mosaic.version = 11 : i64} {
  func.func @_patch_embed_kernel(%arg0: i32, %arg1: i32, %arg2: memref<1x10x17x16xf32, #tpu.memory_space<vmem>>, %arg3: memref<64x128xf32, #tpu.memory_space<vmem>>, %arg4: memref<1x128xf32, #tpu.memory_space<vmem>>, %arg5: memref<1x128xf32, #tpu.memory_space<vmem>>, %arg6: memref<1x128xf32, #tpu.memory_space<vmem>>, %arg7: memref<1x144x128xf32, #tpu.memory_space<vmem>>) attributes {dimension_semantics = [#tpu.dimension_semantics<parallel>, #tpu.dimension_semantics<parallel>], iteration_bounds = array<i64: 2, 1>, scalar_prefetch = 0 : i64, scratch_operands = 0 : i64, tpu.core_type = #tpu.core_type<tc>, window_params = [{transform_indices = @transform_0, window_bounds = array<i64: 1, 10, 17, 16>}, {pipeline_mode = #tpu.pipeline_mode<synchronous>, transform_indices = @transform_1, window_bounds = array<i64: 64, 128>}, {pipeline_mode = #tpu.pipeline_mode<synchronous>, transform_indices = @transform_2, window_bounds = array<i64: 1, 128>}, {pipeline_mode = #tpu.pipeline_mode<synchronous>, transform_indices = @transform_3, window_bounds = array<i64: 1, 128>}, {pipeline_mode = #tpu.pipeline_mode<synchronous>, transform_indices = @transform_4, window_bounds = array<i64: 1, 128>}, {transform_indices = @transform_5, window_bounds = array<i64: 1, 144, 128>}]} {
    %c9_i32 = arith.constant 9 : i32
    %0 = arith.muli %arg1, %c9_i32 : i32
    %c0 = arith.constant 0 : index
    %1 = arith.index_cast %0 : i32 to index
    %c0_0 = arith.constant 0 : index
    %c0_1 = arith.constant 0 : index
    %2 = vector.load %arg2[%c0, %1, %c0_0, %c0_1] : memref<1x10x17x16xf32, #tpu.memory_space<vmem>>, vector<1x10x16x16xf32>
    %3 = vector.shape_cast %2 : vector<1x10x16x16xf32> to vector<10x16x16xf32>
    %c0_2 = arith.constant 0 : index
    %4 = arith.index_cast %0 : i32 to index
    %c1 = arith.constant 1 : index
    %c0_3 = arith.constant 0 : index
    %5 = vector.load %arg2[%c0_2, %4, %c1, %c0_3] : memref<1x10x17x16xf32, #tpu.memory_space<vmem>>, vector<1x10x16x16xf32>
    %6 = vector.shape_cast %5 : vector<1x10x16x16xf32> to vector<10x16x16xf32>
    %7 = vector.extract_strided_slice %3 {offsets = [0, 0, 0], sizes = [9, 16, 16], strides = [1, 1, 1]} : vector<10x16x16xf32> to vector<9x16x16xf32>
    %8 = vector.shape_cast %7 : vector<9x16x16xf32> to vector<144x16xf32>
    %9 = vector.extract_strided_slice %6 {offsets = [0, 0, 0], sizes = [9, 16, 16], strides = [1, 1, 1]} : vector<10x16x16xf32> to vector<9x16x16xf32>
    %10 = vector.shape_cast %9 : vector<9x16x16xf32> to vector<144x16xf32>
    %11 = vector.extract_strided_slice %3 {offsets = [1, 0, 0], sizes = [9, 16, 16], strides = [1, 1, 1]} : vector<10x16x16xf32> to vector<9x16x16xf32>
    %12 = vector.shape_cast %11 : vector<9x16x16xf32> to vector<144x16xf32>
    %13 = vector.extract_strided_slice %6 {offsets = [1, 0, 0], sizes = [9, 16, 16], strides = [1, 1, 1]} : vector<10x16x16xf32> to vector<9x16x16xf32>
    %14 = vector.shape_cast %13 : vector<9x16x16xf32> to vector<144x16xf32>
    %15 = tpu.concatenate %8, %10, %12, %14 in 1 : vector<144x16xf32>, vector<144x16xf32>, vector<144x16xf32>, vector<144x16xf32> -> vector<144x64xf32>
    %c0_4 = arith.constant 0 : index
    %c0_5 = arith.constant 0 : index
    %16 = vector.load %arg3[%c0_4, %c0_5] : memref<64x128xf32, #tpu.memory_space<vmem>>, vector<64x128xf32>
    %cst = arith.constant dense<0.000000e+00> : vector<144x128xf32>
    %17 = tpu.matmul %15, %16, %cst {dimension_numbers = #tpu.dot_dimension_numbers<[1], [0], [0], [1], [0, 0, 1, 1], [], []>} : vector<144x64xf32>, vector<64x128xf32>, vector<144x128xf32> -> vector<144x128xf32>
    %c0_6 = arith.constant 0 : index
    %c0_7 = arith.constant 0 : index
    %18 = vector.load %arg4[%c0_6, %c0_7] : memref<1x128xf32, #tpu.memory_space<vmem>>, vector<1x128xf32>
    %19 = vector.broadcast %18 : vector<1x128xf32> to vector<144x128xf32>
    %20 = arith.addf %17, %19 : vector<144x128xf32>
    %cst_8 = arith.constant dense<0.000000e+00> : vector<144xf32>
    %21 = vector.multi_reduction <add>, %20, %cst_8 [1] : vector<144x128xf32> to vector<144xf32>
    %22 = vector.shape_cast %21 : vector<144xf32> to vector<144x1xf32>
    %cst_9 = arith.constant 3.125000e-02 : f32
    %23 = vector.broadcast %cst_9 : f32 to vector<144x1xf32>
    %24 = arith.mulf %22, %23 : vector<144x1xf32>
    %25 = arith.mulf %20, %20 : vector<144x128xf32>
    %cst_10 = arith.constant dense<0.000000e+00> : vector<144xf32>
    %26 = vector.multi_reduction <add>, %25, %cst_10 [1] : vector<144x128xf32> to vector<144xf32>
    %27 = vector.shape_cast %26 : vector<144xf32> to vector<144x1xf32>
    %cst_11 = arith.constant 3.125000e-02 : f32
    %28 = vector.broadcast %cst_11 : f32 to vector<144x1xf32>
    %29 = arith.mulf %27, %28 : vector<144x1xf32>
    %30 = arith.mulf %24, %24 : vector<144x1xf32>
    %31 = arith.subf %29, %30 : vector<144x1xf32>
    %cst_12 = arith.constant 0.000000e+00 : f32
    %32 = vector.broadcast %cst_12 : f32 to vector<144x1xf32>
    %33 = arith.maximumf %31, %32 : vector<144x1xf32>
    %34 = vector.broadcast %24 : vector<144x1xf32> to vector<144x128xf32>
    %35 = arith.subf %20, %34 : vector<144x128xf32>
    %cst_13 = arith.constant 9.99999974E-6 : f32
    %36 = vector.broadcast %cst_13 : f32 to vector<144x1xf32>
    %37 = arith.addf %33, %36 : vector<144x1xf32>
    %38 = math.rsqrt %37 : vector<144x1xf32>
    %39 = vector.broadcast %38 : vector<144x1xf32> to vector<144x128xf32>
    %40 = arith.mulf %35, %39 : vector<144x128xf32>
    %c0_14 = arith.constant 0 : index
    %c0_15 = arith.constant 0 : index
    %41 = vector.load %arg5[%c0_14, %c0_15] : memref<1x128xf32, #tpu.memory_space<vmem>>, vector<1x128xf32>
    %42 = vector.broadcast %41 : vector<1x128xf32> to vector<144x128xf32>
    %43 = arith.mulf %40, %42 : vector<144x128xf32>
    %c0_16 = arith.constant 0 : index
    %c0_17 = arith.constant 0 : index
    %44 = vector.load %arg6[%c0_16, %c0_17] : memref<1x128xf32, #tpu.memory_space<vmem>>, vector<1x128xf32>
    %45 = vector.broadcast %44 : vector<1x128xf32> to vector<144x128xf32>
    %46 = arith.addf %43, %45 : vector<144x128xf32>
    %c0_18 = arith.constant 0 : index
    %c0_19 = arith.constant 0 : index
    %c0_20 = arith.constant 0 : index
    %47 = vector.load %arg7[%c0_18, %c0_19, %c0_20] : memref<1x144x128xf32, #tpu.memory_space<vmem>>, vector<1x144x128xf32>
    %48 = vector.shape_cast %47 : vector<1x144x128xf32> to vector<144x128xf32>
    %49 = vector.shape_cast %46 : vector<144x128xf32> to vector<1x144x128xf32>
    tpu.vector_store %arg7[%c0_18, %c0_19, %c0_20], %49 {strides = array<i32>} : memref<1x144x128xf32, #tpu.memory_space<vmem>>, vector<1x144x128xf32>,
    return
  }
  func.func @transform_0(%arg0: i32, %arg1: i32) -> (i32, i32, i32, i32) {
    %c0_i32 = arith.constant 0 : i32
    %c0_i32_0 = arith.constant 0 : i32
    %c0_i32_1 = arith.constant 0 : i32
    %c0_i32_2 = arith.constant 0 : i32
    return %arg0, %c0_i32, %c0_i32_0, %c0_i32_1 : i32, i32, i32, i32
  }
  func.func @transform_1(%arg0: i32, %arg1: i32) -> (i32, i32) {
    %c0_i32 = arith.constant 0 : i32
    %c0_i32_0 = arith.constant 0 : i32
    %c0_i32_1 = arith.constant 0 : i32
    return %c0_i32, %c0_i32_0 : i32, i32
  }
  func.func @transform_2(%arg0: i32, %arg1: i32) -> (i32, i32) {
    %c0_i32 = arith.constant 0 : i32
    %c0_i32_0 = arith.constant 0 : i32
    %c0_i32_1 = arith.constant 0 : i32
    return %c0_i32, %c0_i32_0 : i32, i32
  }
  func.func @transform_3(%arg0: i32, %arg1: i32) -> (i32, i32) {
    %c0_i32 = arith.constant 0 : i32
    %c0_i32_0 = arith.constant 0 : i32
    %c0_i32_1 = arith.constant 0 : i32
    return %c0_i32, %c0_i32_0 : i32, i32
  }
  func.func @transform_4(%arg0: i32, %arg1: i32) -> (i32, i32) {
    %c0_i32 = arith.constant 0 : i32
    %c0_i32_0 = arith.constant 0 : i32
    %c0_i32_1 = arith.constant 0 : i32
    return %c0_i32, %c0_i32_0 : i32, i32
  }
  func.func @transform_5(%arg0: i32, %arg1: i32) -> (i32, i32, i32) {
    %c0_i32 = arith.constant 0 : i32
    %c0_i32_0 = arith.constant 0 : i32
    return %arg0, %arg1, %c0_i32 : i32, i32, i32
  }
}

module attributes {stable_mosaic.version = 11 : i64} {
  func.func @_patch_embed_kernel(%arg0: i32, %arg1: i32, %arg2: memref<1x10x17x16xf32, #tpu.memory_space<vmem>>, %arg3: memref<64x128xf32, #tpu.memory_space<vmem>>, %arg4: memref<1x128xf32, #tpu.memory_space<vmem>>, %arg5: memref<1x128xf32, #tpu.memory_space<vmem>>, %arg6: memref<1x128xf32, #tpu.memory_space<vmem>>, %arg7: memref<1x144x128xf32, #tpu.memory_space<vmem>>) attributes {dimension_semantics = [#tpu.dimension_semantics<parallel>, #tpu.dimension_semantics<parallel>], iteration_bounds = array<i64: 2, 1>, scalar_prefetch = 0 : i64, scratch_operands = 0 : i64, tpu.core_type = #tpu.core_type<tc>, window_params = [{transform_indices = @transform_0, window_bounds = array<i64: 1, 10, 17, 16>}, {pipeline_mode = #tpu.pipeline_mode<synchronous>, transform_indices = @transform_1, window_bounds = array<i64: 64, 128>}, {pipeline_mode = #tpu.pipeline_mode<synchronous>, transform_indices = @transform_2, window_bounds = array<i64: 1, 128>}, {pipeline_mode = #tpu.pipeline_mode<synchronous>, transform_indices = @transform_3, window_bounds = array<i64: 1, 128>}, {pipeline_mode = #tpu.pipeline_mode<synchronous>, transform_indices = @transform_4, window_bounds = array<i64: 1, 128>}, {transform_indices = @transform_5, window_bounds = array<i64: 1, 144, 128>}]} {
    %c9_i32 = arith.constant 9 : i32
    %0 = arith.muli %arg1, %c9_i32 : i32
    %c0 = arith.constant 0 : index
    %1 = arith.index_cast %0 : i32 to index
    %c0_0 = arith.constant 0 : index
    %c0_1 = arith.constant 0 : index
    %2 = vector.load %arg2[%c0, %1, %c0_0, %c0_1] : memref<1x10x17x16xf32, #tpu.memory_space<vmem>>, vector<1x10x16x16xf32>
    %3 = vector.shape_cast %2 : vector<1x10x16x16xf32> to vector<10x16x16xf32>
    %c0_2 = arith.constant 0 : index
    %4 = arith.index_cast %0 : i32 to index
    %c1 = arith.constant 1 : index
    %c0_3 = arith.constant 0 : index
    %5 = vector.load %arg2[%c0_2, %4, %c1, %c0_3] : memref<1x10x17x16xf32, #tpu.memory_space<vmem>>, vector<1x10x16x16xf32>
    %6 = vector.shape_cast %5 : vector<1x10x16x16xf32> to vector<10x16x16xf32>
    %7 = vector.extract_strided_slice %3 {offsets = [0, 0, 0], sizes = [9, 16, 16], strides = [1, 1, 1]} : vector<10x16x16xf32> to vector<9x16x16xf32>
    %8 = vector.shape_cast %7 : vector<9x16x16xf32> to vector<144x16xf32>
    %9 = vector.extract_strided_slice %6 {offsets = [0, 0, 0], sizes = [9, 16, 16], strides = [1, 1, 1]} : vector<10x16x16xf32> to vector<9x16x16xf32>
    %10 = vector.shape_cast %9 : vector<9x16x16xf32> to vector<144x16xf32>
    %11 = vector.extract_strided_slice %3 {offsets = [1, 0, 0], sizes = [9, 16, 16], strides = [1, 1, 1]} : vector<10x16x16xf32> to vector<9x16x16xf32>
    %12 = vector.shape_cast %11 : vector<9x16x16xf32> to vector<144x16xf32>
    %13 = vector.extract_strided_slice %6 {offsets = [1, 0, 0], sizes = [9, 16, 16], strides = [1, 1, 1]} : vector<10x16x16xf32> to vector<9x16x16xf32>
    %14 = vector.shape_cast %13 : vector<9x16x16xf32> to vector<144x16xf32>
    %cst = arith.constant 0.000000e+00 : f32
    %15 = vector.broadcast %cst : f32 to vector<144x128xf32>
    %c0_4 = arith.constant 0 : index
    %c0_5 = arith.constant 0 : index
    %16 = vector.load %arg3[%c0_4, %c0_5] : memref<64x128xf32, #tpu.memory_space<vmem>>, vector<16x128xf32>
    %cst_6 = arith.constant dense<0.000000e+00> : vector<144x128xf32>
    %17 = tpu.matmul %8, %16, %cst_6 {dimension_numbers = #tpu.dot_dimension_numbers<[1], [0], [0], [1], [0, 0, 1, 1], [], []>} : vector<144x16xf32>, vector<16x128xf32>, vector<144x128xf32> -> vector<144x128xf32>
    %18 = arith.addf %15, %17 : vector<144x128xf32>
    %c16 = arith.constant 16 : index
    %c0_7 = arith.constant 0 : index
    %19 = vector.load %arg3[%c16, %c0_7] : memref<64x128xf32, #tpu.memory_space<vmem>>, vector<16x128xf32>
    %cst_8 = arith.constant dense<0.000000e+00> : vector<144x128xf32>
    %20 = tpu.matmul %10, %19, %cst_8 {dimension_numbers = #tpu.dot_dimension_numbers<[1], [0], [0], [1], [0, 0, 1, 1], [], []>} : vector<144x16xf32>, vector<16x128xf32>, vector<144x128xf32> -> vector<144x128xf32>
    %21 = arith.addf %18, %20 : vector<144x128xf32>
    %c32 = arith.constant 32 : index
    %c0_9 = arith.constant 0 : index
    %22 = vector.load %arg3[%c32, %c0_9] : memref<64x128xf32, #tpu.memory_space<vmem>>, vector<16x128xf32>
    %cst_10 = arith.constant dense<0.000000e+00> : vector<144x128xf32>
    %23 = tpu.matmul %12, %22, %cst_10 {dimension_numbers = #tpu.dot_dimension_numbers<[1], [0], [0], [1], [0, 0, 1, 1], [], []>} : vector<144x16xf32>, vector<16x128xf32>, vector<144x128xf32> -> vector<144x128xf32>
    %24 = arith.addf %21, %23 : vector<144x128xf32>
    %c48 = arith.constant 48 : index
    %c0_11 = arith.constant 0 : index
    %25 = vector.load %arg3[%c48, %c0_11] : memref<64x128xf32, #tpu.memory_space<vmem>>, vector<16x128xf32>
    %cst_12 = arith.constant dense<0.000000e+00> : vector<144x128xf32>
    %26 = tpu.matmul %14, %25, %cst_12 {dimension_numbers = #tpu.dot_dimension_numbers<[1], [0], [0], [1], [0, 0, 1, 1], [], []>} : vector<144x16xf32>, vector<16x128xf32>, vector<144x128xf32> -> vector<144x128xf32>
    %27 = arith.addf %24, %26 : vector<144x128xf32>
    %c0_13 = arith.constant 0 : index
    %c0_14 = arith.constant 0 : index
    %28 = vector.load %arg4[%c0_13, %c0_14] : memref<1x128xf32, #tpu.memory_space<vmem>>, vector<1x128xf32>
    %29 = vector.broadcast %28 : vector<1x128xf32> to vector<144x128xf32>
    %30 = arith.addf %27, %29 : vector<144x128xf32>
    %cst_15 = arith.constant dense<0.000000e+00> : vector<144xf32>
    %31 = vector.multi_reduction <add>, %30, %cst_15 [1] : vector<144x128xf32> to vector<144xf32>
    %32 = vector.shape_cast %31 : vector<144xf32> to vector<144x1xf32>
    %cst_16 = arith.constant 3.125000e-02 : f32
    %33 = vector.broadcast %cst_16 : f32 to vector<144x1xf32>
    %34 = arith.mulf %32, %33 : vector<144x1xf32>
    %35 = arith.mulf %30, %30 : vector<144x128xf32>
    %cst_17 = arith.constant dense<0.000000e+00> : vector<144xf32>
    %36 = vector.multi_reduction <add>, %35, %cst_17 [1] : vector<144x128xf32> to vector<144xf32>
    %37 = vector.shape_cast %36 : vector<144xf32> to vector<144x1xf32>
    %cst_18 = arith.constant 3.125000e-02 : f32
    %38 = vector.broadcast %cst_18 : f32 to vector<144x1xf32>
    %39 = arith.mulf %37, %38 : vector<144x1xf32>
    %40 = arith.mulf %34, %34 : vector<144x1xf32>
    %41 = arith.subf %39, %40 : vector<144x1xf32>
    %cst_19 = arith.constant 0.000000e+00 : f32
    %42 = vector.broadcast %cst_19 : f32 to vector<144x1xf32>
    %43 = arith.maximumf %41, %42 : vector<144x1xf32>
    %44 = vector.broadcast %34 : vector<144x1xf32> to vector<144x128xf32>
    %45 = arith.subf %30, %44 : vector<144x128xf32>
    %cst_20 = arith.constant 9.99999974E-6 : f32
    %46 = vector.broadcast %cst_20 : f32 to vector<144x1xf32>
    %47 = arith.addf %43, %46 : vector<144x1xf32>
    %48 = math.rsqrt %47 : vector<144x1xf32>
    %49 = vector.broadcast %48 : vector<144x1xf32> to vector<144x128xf32>
    %50 = arith.mulf %45, %49 : vector<144x128xf32>
    %c0_21 = arith.constant 0 : index
    %c0_22 = arith.constant 0 : index
    %51 = vector.load %arg5[%c0_21, %c0_22] : memref<1x128xf32, #tpu.memory_space<vmem>>, vector<1x128xf32>
    %52 = vector.broadcast %51 : vector<1x128xf32> to vector<144x128xf32>
    %53 = arith.mulf %50, %52 : vector<144x128xf32>
    %c0_23 = arith.constant 0 : index
    %c0_24 = arith.constant 0 : index
    %54 = vector.load %arg6[%c0_23, %c0_24] : memref<1x128xf32, #tpu.memory_space<vmem>>, vector<1x128xf32>
    %55 = vector.broadcast %54 : vector<1x128xf32> to vector<144x128xf32>
    %56 = arith.addf %53, %55 : vector<144x128xf32>
    %c0_25 = arith.constant 0 : index
    %c0_26 = arith.constant 0 : index
    %c0_27 = arith.constant 0 : index
    %57 = vector.load %arg7[%c0_25, %c0_26, %c0_27] : memref<1x144x128xf32, #tpu.memory_space<vmem>>, vector<1x144x128xf32>
    %58 = vector.shape_cast %57 : vector<1x144x128xf32> to vector<144x128xf32>
    %59 = vector.shape_cast %56 : vector<144x128xf32> to vector<1x144x128xf32>
    tpu.vector_store %arg7[%c0_25, %c0_26, %c0_27], %59 {strides = array<i32>} : memref<1x144x128xf32, #tpu.memory_space<vmem>>, vector<1x144x128xf32>,
    return
  }
  func.func @transform_0(%arg0: i32, %arg1: i32) -> (i32, i32, i32, i32) {
    %c0_i32 = arith.constant 0 : i32
    %c0_i32_0 = arith.constant 0 : i32
    %c0_i32_1 = arith.constant 0 : i32
    %c0_i32_2 = arith.constant 0 : i32
    return %arg0, %c0_i32, %c0_i32_0, %c0_i32_1 : i32, i32, i32, i32
  }
  func.func @transform_1(%arg0: i32, %arg1: i32) -> (i32, i32) {
    %c0_i32 = arith.constant 0 : i32
    %c0_i32_0 = arith.constant 0 : i32
    %c0_i32_1 = arith.constant 0 : i32
    return %c0_i32, %c0_i32_0 : i32, i32
  }
  func.func @transform_2(%arg0: i32, %arg1: i32) -> (i32, i32) {
    %c0_i32 = arith.constant 0 : i32
    %c0_i32_0 = arith.constant 0 : i32
    %c0_i32_1 = arith.constant 0 : i32
    return %c0_i32, %c0_i32_0 : i32, i32
  }
  func.func @transform_3(%arg0: i32, %arg1: i32) -> (i32, i32) {
    %c0_i32 = arith.constant 0 : i32
    %c0_i32_0 = arith.constant 0 : i32
    %c0_i32_1 = arith.constant 0 : i32
    return %c0_i32, %c0_i32_0 : i32, i32
  }
  func.func @transform_4(%arg0: i32, %arg1: i32) -> (i32, i32) {
    %c0_i32 = arith.constant 0 : i32
    %c0_i32_0 = arith.constant 0 : i32
    %c0_i32_1 = arith.constant 0 : i32
    return %c0_i32, %c0_i32_0 : i32, i32
  }
  func.func @transform_5(%arg0: i32, %arg1: i32) -> (i32, i32, i32) {
    %c0_i32 = arith.constant 0 : i32
    %c0_i32_0 = arith.constant 0 : i32
    return %arg0, %arg1, %c0_i32 : i32, i32, i32
  }
}

</mosaic_0001>

<bundles_post_ra>
// kernel: tpu_custom_call.1
= control target key start
LH: loop header
LB: loop body
LE: loop exit
PB: predicated region body
PF: predicated region fallthrough
CT: control target
= control target key end

     0   :  { %10 = vsyncpa [#allocation3], 0  ;;  %s2134_s0 = inlined_call_operand.vmem [shape: f32[2,10,17,16], index: 0, kind: input, shape index: {}]   ;;  %s2135_s1 = inlined_call_operand.vmem [shape: f32[64,128], index: 1, kind: input, shape index: {}]   ;;  %s2136_s2 = inlined_call_operand.vmem [shape: f32[1,128], index: 2, kind: input, shape index: {}]   ;;  %s2137_s3 = inlined_call_operand.vmem [shape: f32[1,128], index: 3, kind: input, shape index: {}]   ;;  %s2138_s4 = inlined_call_operand.vmem [shape: f32[1,128], index: 4, kind: input, shape index: {}]   ;;  %s2139_s5 = inlined_call_operand.hbm [shape: f32[2,144,128], index: 5, kind: output, shape index: {}]  }
   0x1   :  { %12 = vsyncpa [#allocation3 + $0x1], 0  ;;  %s1502_s18 = smov 0   ;;  %s1504_s19 = smov 0  }
   0x2   :  { %s1506_s20 = smov 0   ;;  %s1508_s21 = smov 0  }
   0x3   :  { %s1510_s22 = smov 0   ;;  %s1512_s23 = smov 0  }
   0x4 LB: > { %s1174_s24 = sadd.s32 4294967295, %s1464_s23   ;;  %s1175_s25 = sadd.s32 4294967294, %s1464_s23   ;;  %s1464_s23 = sphi %s1512_s23, %s18_s23   ;;  %s1460_s22 = sphi %s1510_s22, %s2146_s22   ;;  %s1456_s21 = sphi %s1508_s21, %s2145_s21   ;;  %s1452_s20 = sphi %s1506_s20, %s2144_s20   ;;  %s1448_s19 = sphi %s1504_s19, %s2143_s19   ;;  %s1444_s18 = sphi %s1502_s18, %s2142_s18  }
   0x5   : > { %s30_s26 = sadd.s32 1, %s1460_s22  ;;  %s149_s27 = sadd.s32 1, %s1452_s20 }
   0x6   : > { %p32_p0 = scmp.ge.s32.totalorder %s30_s26, 2  ;;  %p159_p1 = scmp.ne.s32.totalorder %s1452_s20, %s1448_s19 }
   0x7   : > { %p160_p2 = scmp.eq.s32.totalorder %s1174_s24, 1  ;;  %p165_p3 = scmp.ne.s32.totalorder %s1448_s19, %s1444_s18 }
   0x8   : > { %s2148_s26 = smov (%p32_p0, %s30_s26), 0  ;;  %p166_p5 = scmp.eq.s32.totalorder %s1175_s25, 1 }
   0x9   : > { %p1542_p4 = por %p160_p2, %p159_p1  ;;  %s144_s29 = ssub.s32 %s1460_s22, %s2148_s26 }
   0xa   : > { %p1178_p6 = scmp.ge.s32.totalorder %s1464_s23, 1  ;;  %p147_p7 = scmp.eq.s32.totalorder %s144_s29, 0 }
   0xb   : > { %p1549_p8 = por %p166_p5, %p165_p3  ;;  %p204_p9 = scmp.lt.s32.totalorder %s1464_s23, 3 }
   0xc   : > { %s1555_s6 = scalar_select %p147_p7, %s1452_s20, %s149_s27  }
   0xd   : > { %p205_p10 = pnand %p1178_p6, %p204_p9 }
   0xe   : > { %p232_p11 = scmp.lt.s32.totalorder (!%p205_p10), %s1456_s21, 1  ;;  %s1466_s7 = smov (!%p205_p10), 16  }
   0xf   : > { %208 = sbr.rel (%p205_p10) target bundleno = 641 (0x281), region = 40  ;;  %s1467_s8 = smov (!%p205_p10), 32  }
  0x10   : > { %s1468_s15 = smov (!%p205_p10), 48   ;;  %s229_s24 = sand.u32 (!%p205_p10), 1, %s1448_s19  }
  0x11   : > { %s1289_s29 = smul.u32 (!%p205_p10), 144, %s229_s24  ;;  %s1469_s16 = smov (!%p205_p10), [#allocation2]  }
  0x12   : > { %s1291_s10 = smul.u32 (!%p205_p10), 2304, %s1456_s21  ;;  %s1392_s17 = sshll.u32 (!%p205_p10), %s1469_s16, 4  ;;  %s1393_s17 = int_to_ptr.vmem [resolvable:$false] %s1392_s17 }
  0x13   : > { %s1968_s9 = scalar_lea.vmem (!%p205_p10), [#allocation2], %s1289_s29 }
  0x14   : > { %v545_v0 = vld [vmem:[%s2135_s1 + $0x38] sm:$0xff]  ;;  %v544_v1 = vld [vmem:[%s2135_s1 + $0x30] sm:$0xff]  ;;  %s233_s11 = scalar_select %p232_p11, %s1456_s21, 1  ;;  %v543_v2 = vld [vmem:[%s2135_s1 + $0x28] sm:$0xff]  ;;  %vm481_vm0 = vcmask 130048   ;;  %vm500_vm1 = vcmask 261120  }
  0x15   : > { %1230 = vmatprep.subr.mxu0 %v545_v0  ;;  %1273 = vmatprep.subr.mxu1 %v545_v0  ;;  %v542_v3 = vld [vmem:[%s2135_s1 + $0x20] sm:$0xff]  ;;  %v541_v6 = vld [vmem:[%s2135_s1 + $0x18] sm:$0xff]  ;;  %v540_v9 = vld [vmem:[%s2135_s1 + $0x10] sm:$0xff]  ;;  %vm519_vm2 = vcmask 392192   ;;  %vm553_vm3 = vcmask 523264   ;;  %s2089_s21 = scalar_lea.sflag [#allocation3], %s229_s24 }
  0x16   : > { %1231 = vmatpush3.msra.mxu0 %v545_v0  ;;  %1281 = vmatpush3.msra.mxu1 %v545_v0  ;;  %s1290_s14 = smul.u32 240, %s233_s11  ;;  %v539_v10 = vld [vmem:[%s2135_s1 + $0x8] sm:$0xff]  ;;  %v538_v13 = vld [vmem:[%s2135_s1] sm:$0xff]  ;;  %s1099_s11 = sshll.u32 %s1968_s9, 4  ;;  %s2084_s11 = int_to_ptr.vmem [resolvable:$true] %s1099_s11 }
  0x17   : > { %1232 = vmatprep.subr.mxu0 %v544_v1  ;;  %1274 = vmatprep.subr.mxu1 %v544_v1  ;;  %p1395_p1 = scmp.lt.s32.totalorder %s2084_s11, %s1393_s17 }
  0x18   : > { %1233 = vmatpush3.msra.mxu0 %v544_v1  ;;  %1282 = vmatpush3.msra.mxu1 %v544_v1  ;;  %s1574_s25 = scalar_lea.vmem %s2134_s0, %s1290_s14  ;;  %s2080_s14 = scalar_lea.hbm %s2139_s5, %s1291_s10 }
  0x19   : > { %1234 = vmatprep.subr.mxu0 %v543_v2  ;;  %1275 = vmatprep.subr.mxu1 %v543_v2  ;;  %v261_v4 = vld [vmem:[%s1574_s25 + $0x1] sm:$0xff]  ;;  %v1578_v5 = vld [vmem:[%s1574_s25 + $0x18] sm:$0xff]  ;;  %v262_v7 = vld [vmem:[%s1574_s25 + $0x9] sm:$0xff] }
  0x1a   : > { %1235 = vmatpush3.msra.mxu0 %v543_v2  ;;  %1283 = vmatpush3.msra.mxu1 %v543_v2  ;;  %v1588_v8 = vld [vmem:[%s1574_s25 + $0x20] sm:$0xff]  ;;  %v1619_v16 = vld [vmem:[%s1574_s25 + $0x30] sm:$0xff]  ;;  %v1629_v18 = vld [vmem:[%s1574_s25 + $0x38] sm:$0xff] }
  0x1b   : > { %1236 = vmatprep.subr.mxu0 %v542_v3  ;;  %1276 = vmatprep.subr.mxu1 %v542_v3  ;;  %v263_v11 = vld [vmem:[%s1574_s25 + $0x19] sm:$0xff]  ;;  %v264_v12 = vld [vmem:[%s1574_s25 + $0x21] sm:$0xff]  ;;  %v1622_v17 = vld [vmem:[%s1574_s25 + $0x90] sm:$0xff] }
  0x1c   : > { %299 = vrot.lane.b32.xlu0 %v261_v4, %s1466_s7  ;;  %371 = vrot.lane.b32.xlu1 %v1578_v5, %s1467_s8  ;;  %v1607_v14 = vld [vmem:[%s1574_s25 + $0x79] sm:$0xff]  ;;  %v1613_v15 = vld [vmem:[%s1574_s25 + $0x81] sm:$0xff] }
  0x1d   : > { %1237 = vmatpush3.msra.mxu0 %v542_v3  ;;  %1284 = vmatpush3.msra.mxu1 %v542_v3  ;;  %v1632_v19 = vld [vmem:[%s1574_s25 + $0x98] sm:$0xff]  ;;  %v1651_v24 = vld [vmem:[%s1574_s25 + $0x48] sm:$0xff]  ;;  %v1661_v26 = vld [vmem:[%s1574_s25 + $0x50] sm:$0xff] }
  0x1e   : > { %1238 = vmatprep.subr.mxu0 %v541_v6  ;;  %1277 = vmatprep.subr.mxu1 %v541_v6  ;;  %v265_v20 = vld [vmem:[%s1574_s25 + $0x31] sm:$0xff]  ;;  %v266_v22 = vld [vmem:[%s1574_s25 + $0x39] sm:$0xff]  ;;  %v1654_v25 = vld [vmem:[%s1574_s25 + $0xa8] sm:$0xff] }
  0x1f   : > { %1239 = vmatpush3.msra.mxu0 %v541_v6  ;;  %1285 = vmatpush3.msra.mxu1 %v541_v6  ;;  %v273_v21 = vld [vmem:[%s1574_s25 + $0x91] sm:$0xff]  ;;  %v274_v23 = vld [vmem:[%s1574_s25 + $0x99] sm:$0xff]  ;;  %v267_v28 = vld [vmem:[%s1574_s25 + $0x49] sm:$0xff] }
  0x20   : > { %301 = vrot.lane.b32.xlu0 %v262_v7, %s1466_s7  ;;  %373 = vrot.lane.b32.xlu1 %v1588_v8, %s1467_s8  ;;  %v1664_v27 = vld [vmem:[%s1574_s25 + $0xb0] sm:$0xff]  ;;  %v1683_v32 = vld [vmem:[%s1574_s25 + $0x60] sm:$0xff] }
  0x21   : > { %1240 = vmatprep.subr.mxu0 %v540_v9  ;;  %1278 = vmatprep.subr.mxu1 %v540_v9  ;;  %v275_v29 = vld [vmem:[%s1574_s25 + $0xa9] sm:$0xff]  ;;  %v268_v30 = vld [vmem:[%s1574_s25 + $0x51] sm:$0xff]  ;;  %v1686_v33 = vld [vmem:[%s1574_s25 + $0xc0] sm:$0xff] }
  0x22   : > { %1241 = vmatpush3.msra.mxu0 %v540_v9  ;;  %1286 = vmatpush3.msra.mxu1 %v540_v9  ;;  %v276_v31 = vld [vmem:[%s1574_s25 + $0xb1] sm:$0xff]  ;;  %v1693_v34 = vld [vmem:[%s1574_s25 + $0x68] sm:$0xff]  ;;  %v252_v42 = vld [vmem:[%s1574_s25 + $0x80] sm:$0xff] }
  0x23   : > { %1242 = vmatprep.subr.mxu0 %v539_v10  ;;  %1279 = vmatprep.subr.mxu1 %v539_v10  ;;  %v1696_v35 = vld [vmem:[%s1574_s25 + $0xc8] sm:$0xff]  ;;  %v251_v40 = vld [vmem:[%s1574_s25 + $0x78] sm:$0xff]  ;;  %v260_v43 = vld [vmem:[%s1574_s25 + $0xe0] sm:$0xff] }
  0x24   : > { %427 = vrot.lane.b32.xlu0 %v263_v11, %s1468_s15  ;;  %429 = vrot.lane.b32.xlu1 %v264_v12, %s1468_s15  ;;  %v269_v36 = vld [vmem:[%s1574_s25 + $0x61] sm:$0xff]  ;;  %v270_v38 = vld [vmem:[%s1574_s25 + $0x69] sm:$0xff] }
  0x25   : > { %1243 = vmatpush3.msra.mxu0 %v539_v10  ;;  %1287 = vmatpush3.msra.mxu1 %v539_v10  ;;  %v277_v37 = vld [vmem:[%s1574_s25 + $0xc1] sm:$0xff]  ;;  %v278_v39 = vld [vmem:[%s1574_s25 + $0xc9] sm:$0xff]  ;;  %v259_v41 = vld [vmem:[%s1574_s25 + $0xd8] sm:$0xff] }
  0x26   : > { %1244 = vmatprep.subr.mxu0 %v538_v13  ;;  %1280 = vmatprep.subr.mxu1 %v538_v13  ;;  %v279_v44 = vld [vmem:[%s1574_s25 + $0xd9] sm:$0xff]  ;;  %v280_v45 = vld [vmem:[%s1574_s25 + $0xe1] sm:$0xff] }
  0x27   : > { %1245 = vmatpush3.msra.mxu0 %v538_v13  ;;  %1288 = vmatpush3.msra.mxu1 %v538_v13  ;;  %v241_v48 = vld [vmem:[%s1574_s25] sm:$0xff]  ;;  %v242_v49 = vld [vmem:[%s1574_s25 + $0x8] sm:$0xff]  ;;  %s1394_s25 = scalar_lea.vmem %s1393_s17, 4608 }
  0x28   : > { %303 = vrot.lane.b32.xlu0 %v263_v11, %s1466_s7  ;;  %319 = vrot.lane.b32.xlu1 %v1607_v14, %s1466_s7 }
  0x2c   : > { %305 = vrot.lane.b32.xlu0 %v264_v12, %s1466_s7  ;;  %321 = vrot.lane.b32.xlu1 %v1613_v15, %s1466_s7 }
  0x30   : > { %375 = vrot.lane.b32.xlu0 %v1619_v16, %s1467_s8  ;;  %391 = vrot.lane.b32.xlu1 %v1622_v17, %s1467_s8 }
  0x34   : > { %377 = vrot.lane.b32.xlu0 %v1629_v18, %s1467_s8  ;;  %393 = vrot.lane.b32.xlu1 %v1632_v19, %s1467_s8 }
  0x38   : > { %431 = vrot.lane.b32.xlu0 %v265_v20, %s1468_s15  ;;  %447 = vrot.lane.b32.xlu1 %v273_v21, %s1468_s15 }
  0x3c   : > { %433 = vrot.lane.b32.xlu0 %v266_v22, %s1468_s15  ;;  %449 = vrot.lane.b32.xlu1 %v274_v23, %s1468_s15 }
  0x40   : > { %307 = vrot.lane.b32.xlu0 %v265_v20, %s1466_s7  ;;  %323 = vrot.lane.b32.xlu1 %v273_v21, %s1466_s7 }
  0x44   : > { %309 = vrot.lane.b32.xlu0 %v266_v22, %s1466_s7  ;;  %325 = vrot.lane.b32.xlu1 %v274_v23, %s1466_s7 }
  0x48   : > { %379 = vrot.lane.b32.xlu0 %v1651_v24, %s1467_s8  ;;  %395 = vrot.lane.b32.xlu1 %v1654_v25, %s1467_s8 }
  0x4c   : > { %381 = vrot.lane.b32.xlu0 %v1661_v26, %s1467_s8  ;;  %397 = vrot.lane.b32.xlu1 %v1664_v27, %s1467_s8 }
  0x50   : > { %435 = vrot.lane.b32.xlu0 %v267_v28, %s1468_s15  ;;  %451 = vrot.lane.b32.xlu1 %v275_v29, %s1468_s15 }
  0x54   : > { %437 = vrot.lane.b32.xlu0 %v268_v30, %s1468_s15  ;;  %453 = vrot.lane.b32.xlu1 %v276_v31, %s1468_s15 }
  0x58   : > { %311 = vrot.lane.b32.xlu0 %v267_v28, %s1466_s7  ;;  %327 = vrot.lane.b32.xlu1 %v275_v29, %s1466_s7 }
  0x5c   : > { %313 = vrot.lane.b32.xlu0 %v268_v30, %s1466_s7  ;;  %329 = vrot.lane.b32.xlu1 %v276_v31, %s1466_s7 }
  0x60   : > { %383 = vrot.lane.b32.xlu0 %v1683_v32, %s1467_s8  ;;  %399 = vrot.lane.b32.xlu1 %v1686_v33, %s1467_s8 }
  0x64   : > { %385 = vrot.lane.b32.xlu0 %v1693_v34, %s1467_s8  ;;  %401 = vrot.lane.b32.xlu1 %v1696_v35, %s1467_s8 }
  0x68   : > { %439 = vrot.lane.b32.xlu0 %v269_v36, %s1468_s15  ;;  %455 = vrot.lane.b32.xlu1 %v277_v37, %s1468_s15 }
  0x6c   : > { %441 = vrot.lane.b32.xlu0 %v270_v38, %s1468_s15  ;;  %457 = vrot.lane.b32.xlu1 %v278_v39, %s1468_s15 }
  0x70   : > { %315 = vrot.lane.b32.xlu0 %v269_v36, %s1466_s7  ;;  %331 = vrot.lane.b32.xlu1 %v277_v37, %s1466_s7 }
  0x74   : > { %317 = vrot.lane.b32.xlu0 %v270_v38, %s1466_s7  ;;  %333 = vrot.lane.b32.xlu1 %v278_v39, %s1466_s7 }
  0x78   : > { %387 = vrot.lane.b32.xlu0 %v251_v40, %s1467_s8  ;;  %403 = vrot.lane.b32.xlu1 %v259_v41, %s1467_s8 }
  0x7c   : > { %389 = vrot.lane.b32.xlu0 %v252_v42, %s1467_s8  ;;  %405 = vrot.lane.b32.xlu1 %v260_v43, %s1467_s8 }
  0x80   : > { %443 = vrot.lane.b32.xlu0 %v1607_v14, %s1468_s15  ;;  %459 = vrot.lane.b32.xlu1 %v279_v44, %s1468_s15 }
  0x84   : > { %445 = vrot.lane.b32.xlu0 %v1613_v15, %s1468_s15  ;;  %461 = vrot.lane.b32.xlu1 %v280_v45, %s1468_s15  ;;  %s1388_s15 = scalar_lea.vmem %s2084_s11, 2304 }
  0x85   : > { %p1389_p12 = scmp.ne.s32.totalorder %s2084_s11, %s1388_s15  ;;  %p1396_p2 = scmp.lt.s32.totalorder %s1394_s25, %s1388_s15 }
  0x87   : > { %p1390_p13 = pnand %p1389_p12, %p1542_p4  ;;  %p1397_p3 = por %p1396_p2, %p1395_p1 }
  0x89   : > { %p1391_p0 = pneg %p1390_p13 }
  0x8b   : > { %p1398_p5 = pnand %p1397_p3, %p1391_p0 }
  0x8e   : > { %v300_v46 = vpop.permute.xlu0 %299  ;;  %v372_v47 = vpop.permute.xlu1 %371 }
  0x8f   : > { %v482_v52 = vsel %vm481_vm0, %v241_v48, %v300_v46 }
  0x90   : > { %v501_v54 = vsel %vm500_vm1, %v482_v52, %v372_v47 }
  0x92   : > { %v302_v50 = vpop.permute.xlu0 %301  ;;  %v374_v51 = vpop.permute.xlu1 %373 }
  0x93   : > { %v483_v53 = vsel %vm481_vm0, %v242_v49, %v302_v50 }
  0x94   : > { %v502_v55 = vsel %vm500_vm1, %v483_v53, %v374_v51 }
  0x96   : > { %v428_v56 = vpop.permute.xlu0 %427  ;;  %v430_v57 = vpop.permute.xlu1 %429 }
  0x97   : > { %v521_v58 = vsel %vm519_vm2, %v502_v55, %v430_v57  ;;  %v520_v59 = vsel %vm519_vm2, %v501_v54, %v428_v56 }
  0x98   : > { %1246 = vmatprep.mubr.msk.f32.mxu0 %vm553_vm3, %v520_v59 }
  0x99   : > { %1247 = vmatmul.mubr.msk.f32.vlgmr.msra.gmra.mxu0 %vm553_vm3, %v521_v58 }
  0x9a   : > { %v304_v60 = vpop.permute.xlu0 %303  ;;  %v320_v61 = vpop.permute.xlu1 %319 }
  0x9b   : > { %v484_v4 = vsel %vm481_vm0, %v1578_v5, %v304_v60  ;;  %v492_v6 = vsel %vm481_vm0, %v251_v40, %v320_v61 }
  0x9e   : > { %v306_v62 = vpop.permute.xlu0 %305  ;;  %v322_v63 = vpop.permute.xlu1 %321 }
  0x9f   : > { %v485_v12 = vsel %vm481_vm0, %v1588_v8, %v306_v62  ;;  %v493_v5 = vsel %vm481_vm0, %v252_v42, %v322_v63 }
  0xa2   : > { %v376_v0 = vpop.permute.xlu0 %375  ;;  %v392_v1 = vpop.permute.xlu1 %391 }
  0xa3   : > { %v503_v7 = vsel %vm500_vm1, %v484_v4, %v376_v0  ;;  %v511_v9 = vsel %vm500_vm1, %v492_v6, %v392_v1 }
  0xa6   : > { %v378_v2 = vpop.permute.xlu0 %377  ;;  %v394_v3 = vpop.permute.xlu1 %393 }
  0xa7   : > { %v504_v15 = vsel %vm500_vm1, %v485_v12, %v378_v2  ;;  %v512_v20 = vsel %vm500_vm1, %v493_v5, %v394_v3 }
  0xaa   : > { %v432_v10 = vpop.permute.xlu0 %431  ;;  %v448_v11 = vpop.permute.xlu1 %447 }
  0xab   : > { %v522_v13 = vsel %vm519_vm2, %v503_v7, %v432_v10  ;;  %v530_v14 = vsel %vm519_vm2, %v511_v9, %v448_v11 }
  0xac   : > { %1249 = vmatprep.mubr.msk.f32.mxu0 %vm553_vm3, %v522_v13  ;;  %1261 = vmatprep.mubr.msk.f32.mxu1 %vm553_vm3, %v530_v14 }
  0xae   : > { %v434_v21 = vpop.permute.xlu0 %433  ;;  %v450_v22 = vpop.permute.xlu1 %449 }
  0xaf   : > { %v523_v23 = vsel %vm519_vm2, %v504_v15, %v434_v21  ;;  %v531_v8 = vsel %vm519_vm2, %v512_v20, %v450_v22 }
  0xb0   : > { %1250 = vmatmul.mubr.msk.f32.gmra.mxu0 %vm553_vm3, %v523_v23  ;;  %1262 = vmatmul.mubr.msk.f32.vlgmr.msra.gmra.mxu1 %vm553_vm3, %v531_v8 }
  0xb2   : > { %v308_v28 = vpop.permute.xlu0 %307  ;;  %v324_v29 = vpop.permute.xlu1 %323 }
  0xb3   : > { %v486_v40 = vsel %vm481_vm0, %v1619_v16, %v308_v28  ;;  %v494_v41 = vsel %vm481_vm0, %v1622_v17, %v324_v29 }
  0xb6   : > { %v310_v30 = vpop.permute.xlu0 %309  ;;  %v326_v31 = vpop.permute.xlu1 %325 }
  0xb7   : > { %v487_v46 = vsel %vm481_vm0, %v1629_v18, %v310_v30  ;;  %v495_v16 = vsel %vm481_vm0, %v1632_v19, %v326_v31 }
  0xba   : > { %v380_v36 = vpop.permute.xlu0 %379  ;;  %v396_v37 = vpop.permute.xlu1 %395 }
  0xbb   : > { %v505_v42 = vsel %vm500_vm1, %v486_v40, %v380_v36  ;;  %v513_v43 = vsel %vm500_vm1, %v494_v41, %v396_v37  ;;  %v1821_v41 = vld [vmem:[%s2136_s2] ss:$0 sm:$0xff] }
  0xbe   : > { %v382_v38 = vpop.permute.xlu0 %381  ;;  %v398_v39 = vpop.permute.xlu1 %397 }
  0xbf   : > { %v506_v17 = vsel %vm500_vm1, %v487_v46, %v382_v38  ;;  %v514_v49 = vsel %vm500_vm1, %v495_v16, %v398_v39 }
  0xc2   : > { %v436_v44 = vpop.permute.xlu0 %435  ;;  %v452_v45 = vpop.permute.xlu1 %451 }
  0xc3   : > { %v524_v47 = vsel %vm519_vm2, %v505_v42, %v436_v44  ;;  %v532_v48 = vsel %vm519_vm2, %v513_v43, %v452_v45 }
  0xc4   : > { %1252 = vmatprep.mubr.msk.f32.mxu0 %vm553_vm3, %v524_v47  ;;  %1264 = vmatprep.mubr.msk.f32.mxu1 %vm553_vm3, %v532_v48 }
  0xc6   : > { %v438_v50 = vpop.permute.xlu0 %437  ;;  %v454_v51 = vpop.permute.xlu1 %453 }
  0xc7   : > { %v525_v52 = vsel %vm519_vm2, %v506_v17, %v438_v50  ;;  %v533_v18 = vsel %vm519_vm2, %v514_v49, %v454_v51 }
  0xc8   : > { %1253 = vmatmul.mubr.msk.f32.gmra.mxu0 %vm553_vm3, %v525_v52  ;;  %1265 = vmatmul.mubr.msk.f32.gmra.mxu1 %vm553_vm3, %v533_v18 }
  0xca   : > { %v312_v53 = vpop.permute.xlu0 %311  ;;  %v328_v54 = vpop.permute.xlu1 %327 }
  0xcb   : > { %v488_v60 = vsel %vm481_vm0, %v1651_v24, %v312_v53  ;;  %v496_v61 = vsel %vm481_vm0, %v1654_v25, %v328_v54 }
  0xce   : > { %v314_v55 = vpop.permute.xlu0 %313  ;;  %v330_v56 = vpop.permute.xlu1 %329 }
  0xcf   : > { %v489_v2 = vsel %vm481_vm0, %v1661_v26, %v314_v55  ;;  %v497_v24 = vsel %vm481_vm0, %v1664_v27, %v330_v56 }
  0xd2   : > { %v384_v57 = vpop.permute.xlu0 %383  ;;  %v400_v19 = vpop.permute.xlu1 %399 }
  0xd3   : > { %v507_v62 = vsel %vm500_vm1, %v488_v60, %v384_v57  ;;  %v515_v63 = vsel %vm500_vm1, %v496_v61, %v400_v19 }
  0xd6   : > { %v386_v58 = vpop.permute.xlu0 %385  ;;  %v402_v59 = vpop.permute.xlu1 %401 }
  0xd7   : > { %v508_v25 = vsel %vm500_vm1, %v489_v2, %v386_v58  ;;  %v516_v6 = vsel %vm500_vm1, %v497_v24, %v402_v59 }
  0xda   : > { %v440_v0 = vpop.permute.xlu0 %439  ;;  %v456_v1 = vpop.permute.xlu1 %455 }
  0xdb   : > { %v526_v3 = vsel %vm519_vm2, %v507_v62, %v440_v0  ;;  %v534_v4 = vsel %vm519_vm2, %v515_v63, %v456_v1 }
  0xdc   : > { %1255 = vmatprep.mubr.msk.f32.mxu0 %vm553_vm3, %v526_v3  ;;  %1267 = vmatprep.mubr.msk.f32.mxu1 %vm553_vm3, %v534_v4 }
  0xde   : > { %v442_v7 = vpop.permute.xlu0 %441  ;;  %v458_v9 = vpop.permute.xlu1 %457 }
  0xdf   : > { %v527_v10 = vsel %vm519_vm2, %v508_v25, %v442_v7  ;;  %v535_v26 = vsel %vm519_vm2, %v516_v6, %v458_v9 }
  0xe0   : > { %1256 = vmatmul.mubr.msk.f32.gmra.mxu0 %vm553_vm3, %v527_v10  ;;  %1268 = vmatmul.mubr.msk.f32.gmra.mxu1 %vm553_vm3, %v535_v26 }
  0xe2   : > { %v316_v11 = vpop.permute.xlu0 %315  ;;  %v332_v12 = vpop.permute.xlu1 %331 }
  0xe3   : > { %v490_v21 = vsel %vm481_vm0, %v1683_v32, %v316_v11  ;;  %v498_v22 = vsel %vm481_vm0, %v1686_v33, %v332_v12 }
  0xe6   : > { %v318_v13 = vpop.permute.xlu0 %317  ;;  %v334_v14 = vpop.permute.xlu1 %333 }
  0xe7   : > { %v491_v30 = vsel %vm481_vm0, %v1693_v34, %v318_v13  ;;  %v499_v32 = vsel %vm481_vm0, %v1696_v35, %v334_v14 }
  0xea   : > { %v388_v5 = vpop.permute.xlu0 %387  ;;  %v404_v27 = vpop.permute.xlu1 %403 }
  0xeb   : > { %v509_v23 = vsel %vm500_vm1, %v490_v21, %v388_v5  ;;  %v517_v8 = vsel %vm500_vm1, %v498_v22, %v404_v27 }
  0xee   : > { %v390_v15 = vpop.permute.xlu0 %389  ;;  %v406_v20 = vpop.permute.xlu1 %405 }
  0xef   : > { %v510_v33 = vsel %vm500_vm1, %v491_v30, %v390_v15  ;;  %v518_v37 = vsel %vm500_vm1, %v499_v32, %v406_v20 }
  0xf2   : > { %v444_v28 = vpop.permute.xlu0 %443  ;;  %v460_v29 = vpop.permute.xlu1 %459 }
  0xf3   : > { %v528_v31 = vsel %vm519_vm2, %v509_v23, %v444_v28  ;;  %v536_v36 = vsel %vm519_vm2, %v517_v8, %v460_v29 }
  0xf4   : > { %1258 = vmatprep.mubr.msk.f32.mxu0 %vm553_vm3, %v528_v31  ;;  %1270 = vmatprep.mubr.msk.f32.mxu1 %vm553_vm3, %v536_v36 }
  0xf6   : > { %v446_v38 = vpop.permute.xlu0 %445  ;;  %v462_v39 = vpop.permute.xlu1 %461 }
  0xf7   : > { %v529_v40 = vsel %vm519_vm2, %v510_v33, %v446_v38  ;;  %v537_v34 = vsel %vm519_vm2, %v518_v37, %v462_v39 }
  0xf8   : > { %1259 = vmatmul.mubr.msk.f32.gmra.mxu0 %vm553_vm3, %v529_v40  ;;  %1271 = vmatmul.mubr.msk.f32.gmra.mxu1 %vm553_vm3, %v537_v34 }
 0x159   : > { %v1248_v35 = vpop.f32.mrf.mxu0 }
 0x15a   : > { %v1824_v42 = vadd.f32 %v1248_v35, %v1821_v41 }
 0x15b   : > { %v674_v43 = vpop.f32.mrf.mxu0 }
 0x15c   : > { %765 = vadd.xlane.f32.xlu1 %v1824_v42  ;;  %v1831_v47 = vadd.f32 %v1821_v41, %v674_v43  ;;  %v818_v17 = vmul.f32 %v1824_v42, %v1824_v42 }
 0x15e   : > { %v817_v16 = vmul.f32 %v1831_v47, %v1831_v47 }
 0x170   : > { %v1263_v44 = vpop.f32.mrf.mxu1  ;;  %v1251_v51 = vpop.f32.mrf.mxu0 }
 0x171   : > { %v1828_v45 = vadd.f32 %v1263_v44, %v1821_v41  ;;  %v1848_v52 = vadd.f32 %v1251_v51, %v1821_v41 }
 0x172   : > { %v724_v46 = vpop.f32.mrf.mxu1  ;;  %v684_v18 = vpop.f32.mrf.mxu0 }
 0x173   : > { %v1834_v48 = vadd.f32 %v1821_v41, %v724_v46  ;;  %785 = vadd.xlane.f32.xlu0 %v1828_v45  ;;  %v828_v50 = vmul.f32 %v1828_v45, %v1828_v45  ;;  %v1855_v56 = vadd.f32 %v1821_v41, %v684_v18  ;;  %v820_v59 = vmul.f32 %v1848_v52, %v1848_v52 }
 0x175   : > { %783 = vadd.xlane.f32.xlu1 %v1834_v48  ;;  %v827_v49 = vmul.f32 %v1834_v48, %v1834_v48  ;;  %v819_v19 = vmul.f32 %v1855_v56, %v1855_v56 }
 0x177   : > { %763 = vadd.xlane.f32.xlu0 %v1831_v47 }
 0x179   : > { %835 = vadd.xlane.f32.xlu1 %v817_v16 }
 0x17b   : > { %837 = vadd.xlane.f32.xlu0 %v818_v17 }
 0x17d   : > { %855 = vadd.xlane.f32.xlu1 %v827_v49 }
 0x17f   : > { %857 = vadd.xlane.f32.xlu0 %v828_v50 }
 0x183   : > { %769 = vadd.xlane.f32.xlu0 %v1848_v52 }
 0x188   : > { %v1266_v53 = vpop.f32.mrf.mxu1  ;;  %v1254_v58 = vpop.f32.mrf.mxu0 }
 0x189   : > { %v1852_v54 = vadd.f32 %v1266_v53, %v1821_v41  ;;  %v1875_v0 = vadd.f32 %v1254_v58, %v1821_v41 }
 0x18a   : > { %v734_v55 = vpop.f32.mrf.mxu1  ;;  %v694_v61 = vpop.f32.mrf.mxu0 }
 0x18b   : > { %v1858_v57 = vadd.f32 %v1821_v41, %v734_v55  ;;  %789 = vadd.xlane.f32.xlu0 %v1852_v54  ;;  %v830_v62 = vmul.f32 %v1852_v54, %v1852_v54  ;;  %v1872_v63 = vadd.f32 %v1821_v41, %v694_v61  ;;  %v822_v24 = vmul.f32 %v1875_v0, %v1875_v0 }
 0x18d   : > { %787 = vadd.xlane.f32.xlu1 %v1858_v57  ;;  %v829_v60 = vmul.f32 %v1858_v57, %v1858_v57  ;;  %v821_v25 = vmul.f32 %v1872_v63, %v1872_v63 }
 0x18f   : > { %767 = vadd.xlane.f32.xlu0 %v1855_v56 }
 0x191   : > { %839 = vadd.xlane.f32.xlu1 %v819_v19 }
 0x193   : > { %841 = vadd.xlane.f32.xlu0 %v820_v59 }
 0x195   : > { %859 = vadd.xlane.f32.xlu1 %v829_v60 }
 0x197   : > { %861 = vadd.xlane.f32.xlu0 %v830_v62 }
 0x199   : > { %771 = vadd.xlane.f32.xlu1 %v1872_v63 }
 0x19b   : > { %773 = vadd.xlane.f32.xlu0 %v1875_v0 }
 0x1a0   : > { %v1269_v1 = vpop.f32.mrf.mxu1  ;;  %v1257_v6 = vpop.f32.mrf.mxu0 }
 0x1a1   : > { %v1880_v2 = vadd.f32 %v1269_v1, %v1821_v41  ;;  %v1896_v26 = vadd.f32 %v1257_v6, %v1821_v41 }
 0x1a2   : > { %v744_v3 = vpop.f32.mrf.mxu1  ;;  %v704_v10 = vpop.f32.mrf.mxu0 }
 0x1a3   : > { %v1883_v4 = vadd.f32 %v1821_v41, %v744_v3  ;;  %793 = vadd.xlane.f32.xlu0 %v1880_v2  ;;  %v832_v7 = vmul.f32 %v1880_v2, %v1880_v2  ;;  %v1899_v11 = vadd.f32 %v1821_v41, %v704_v10  ;;  %v824_v15 = vmul.f32 %v1896_v26, %v1896_v26 }
 0x1a5   : > { %791 = vadd.xlane.f32.xlu1 %v1883_v4  ;;  %v831_v9 = vmul.f32 %v1883_v4, %v1883_v4  ;;  %v823_v20 = vmul.f32 %v1899_v11, %v1899_v11 }
 0x1a7   : > { %845 = vadd.xlane.f32.xlu0 %v822_v24 }
 0x1a9   : > { %843 = vadd.xlane.f32.xlu1 %v821_v25 }
 0x1ab   : > { %865 = vadd.xlane.f32.xlu0 %v832_v7 }
 0x1ad   : > { %863 = vadd.xlane.f32.xlu1 %v831_v9 }
 0x1af   : > { %777 = vadd.xlane.f32.xlu0 %v1896_v26 }
 0x1b1   : > { %775 = vadd.xlane.f32.xlu1 %v1899_v11 }
 0x1b8   : > { %v1272_v12 = vpop.f32.mrf.mxu1  ;;  %v1260_v27 = vpop.f32.mrf.mxu0 }
 0x1b9   : > { %v1904_v13 = vadd.f32 %v1272_v12, %v1821_v41  ;;  %v1916_v22 = vadd.f32 %v1260_v27, %v1821_v41 }
 0x1ba   : > { %v754_v14 = vpop.f32.mrf.mxu1  ;;  %v714_v21 = vpop.f32.mrf.mxu0 }
 0x1bb   : > { %v1907_v5 = vadd.f32 %v1821_v41, %v754_v14  ;;  %797 = vadd.xlane.f32.xlu0 %v1904_v13  ;;  %v1919_v23 = vadd.f32 %v1821_v41, %v714_v21  ;;  %v826_v8 = vmul.f32 %v1916_v22, %v1916_v22  ;;  %v834_v29 = vmul.f32 %v1904_v13, %v1904_v13  ;;  %v1940_v14 = vld [vmem:[%s2137_s3] ss:$0 sm:$0xff] }
 0x1bd   : > { %795 = vadd.xlane.f32.xlu1 %v1907_v5  ;;  %v825_v28 = vmul.f32 %v1919_v23, %v1919_v23  ;;  %v833_v30 = vmul.f32 %v1907_v5, %v1907_v5 }
 0x1bf   : > { %849 = vadd.xlane.f32.xlu0 %v824_v15 }
 0x1c1   : > { %847 = vadd.xlane.f32.xlu1 %v823_v20 }
 0x1c3   : > { %781 = vadd.xlane.f32.xlu0 %v1916_v22 }
 0x1c5   : > { %779 = vadd.xlane.f32.xlu1 %v1919_v23 }
 0x1c7   : > { %853 = vadd.xlane.f32.xlu0 %v826_v8 }
 0x1c9   : > { %851 = vadd.xlane.f32.xlu1 %v825_v28 }
 0x1cb   : > { %869 = vadd.xlane.f32.xlu0 %v834_v29  ;;  %v1954_v29 = vld [vmem:[%s2138_s4] ss:$0 sm:$0xff] }
 0x1cd   : > { %867 = vadd.xlane.f32.xlu1 %v833_v30 }
 0x1e5   : > { %v766_v31 = vpop.xlane.xlu1 %765 }
 0x1e6   : > { %v800_v37 = vmul.f32 0.03125, %v766_v31 }
 0x1e8   : > { %v890_v44 = vmul.f32 %v800_v37, %v800_v37  ;;  %v944_v20 = vsub.f32 %v1824_v42, %v800_v37 }
 0x1fc   : > { %v786_v36 = vpop.xlane.xlu0 %785 }
 0x1fd   : > { %v1931_v35 = vmul.f32 0.03125, %v786_v36 }
 0x1fe   : > { %v784_v32 = vpop.xlane.xlu1 %783 }
 0x1ff   : > { %v809_v40 = vmul.f32 0.03125, %v784_v32  ;;  %v900_v53 = vmul.f32 %v1931_v35, %v1931_v35 }
 0x200   : > { %v764_v33 = vpop.xlane.xlu0 %763 }
 0x201   : > { %v799_v38 = vmul.f32 0.03125, %v764_v33  ;;  %v899_v49 = vmul.f32 %v809_v40, %v809_v40  ;;  %v953_v31 = vsub.f32 %v1834_v48, %v809_v40 }
 0x202   : > { %v836_v39 = vpop.xlane.xlu1 %835 }
 0x203   : > { %v889_v34 = vmul.f32 %v799_v38, %v799_v38  ;;  %v871_v41 = vmul.f32 0.03125, %v836_v39  ;;  %v943_v10 = vsub.f32 %v1831_v47, %v799_v38  ;;  %v954_v47 = vsub.f32 %v1828_v45, %v1931_v35 }
 0x204   : > { %v838_v43 = vpop.xlane.xlu0 %837 }
 0x205   : > { %v907_v46 = vsub.f32 %v871_v41, %v889_v34  ;;  %v872_v16 = vmul.f32 0.03125, %v838_v43 }
 0x206   : > { %v856_v17 = vpop.xlane.xlu1 %855 }
 0x207   : > { %v925_v50 = vmax.f32 %v907_v46, 0.0  ;;  %v908_v51 = vsub.f32 %v872_v16, %v890_v44  ;;  %v881_v18 = vmul.f32 0.03125, %v856_v17 }
 0x208   : > { %v858_v55 = vpop.xlane.xlu0 %857 }
 0x209   : > { %v961_v19 = vadd.f32 1e-05, %v925_v50  ;;  %v926_v58 = vmax.f32 %v908_v51, 0.0  ;;  %v917_v59 = vsub.f32 %v881_v18, %v899_v49  ;;  %v882_v60 = vmul.f32 0.03125, %v858_v55 }
 0x20b   : > { %1352 = vrsqrt.f32 %v961_v19  ;;  %v962_v61 = vadd.f32 1e-05, %v926_v58  ;;  %v935_v62 = vmax.f32 %v917_v59, 0.0  ;;  %v918_v1 = vsub.f32 %v882_v60, %v900_v53 }
 0x20c   : > { %v770_v6 = vpop.xlane.xlu0 %769 }
 0x20d   : > { %1354 = vrsqrt.f32 %v962_v61  ;;  %v971_v3 = vadd.f32 1e-05, %v935_v62  ;;  %v936_v24 = vmax.f32 %v918_v1, 0.0  ;;  %v1944_v27 = vmul.f32 0.03125, %v770_v6 }
 0x20f   : > { %1356 = vrsqrt.f32 %v971_v3  ;;  %v972_v25 = vadd.f32 1e-05, %v936_v24  ;;  %v892_v37 = vmul.f32 %v1944_v27, %v1944_v27 }
 0x211   : > { %1358 = vrsqrt.f32 %v972_v25 }
 0x214   : > { %v790_v7 = vpop.xlane.xlu0 %789 }
 0x215   : > { %v1962_v38 = vmul.f32 0.03125, %v790_v7 }
 0x216   : > { %v788_v9 = vpop.xlane.xlu1 %787 }
 0x217   : > { %v1964_v45 = vmul.f32 0.03125, %v788_v9  ;;  %v902_v51 = vmul.f32 %v1962_v38, %v1962_v38 }
 0x218   : > { %v1353_v12 = vpop.eup %1352  ;;  %v768_v15 = vpop.xlane.xlu0 %767 }
 0x219   : > { %v997_v21 = vmul.f32 %v1353_v12, %v943_v10  ;;  %v1947_v8 = vmul.f32 0.03125, %v768_v15  ;;  %v901_v18 = vmul.f32 %v1964_v45, %v1964_v45 }
 0x21a   : > { %v1355_v28 = vpop.eup %1354  ;;  %v840_v30 = vpop.xlane.xlu1 %839 }
 0x21b   : > { %v1022_v36 = vmul.f32 %v1940_v14, %v997_v21  ;;  %v998_v32 = vmul.f32 %v1355_v28, %v944_v20  ;;  %v891_v42 = vmul.f32 %v1947_v8, %v1947_v8  ;;  %v873_v39 = vmul.f32 0.03125, %v840_v30 }
 0x21c   : > { %v1357_v33 = vpop.eup %1356  ;;  %v842_v34 = vpop.xlane.xlu0 %841  ;;  %v945_v30 = vsub.f32 %v1855_v56, %v1947_v8  ;;  %v956_v8 = vsub.f32 %v1852_v54, %v1962_v38 }
 0x21d   : > { %v1047_v41 = vadd.f32 %v1954_v29, %v1022_v36  ;;  %v1023_v48 = vmul.f32 %v1940_v14, %v998_v32  ;;  %v1007_v40 = vmul.f32 %v1357_v33, %v953_v31  ;;  %v874_v35 = vmul.f32 0.03125, %v842_v34 }
 0x21e   : > { %v1359_v43 = vpop.eup %1358  ;;  %v909_v44 = vsub.f32 %v873_v39, %v891_v42  ;;  %v860_v46 = vpop.xlane.xlu1 %859  ;;  %v946_v32 = vsub.f32 %v1848_v52, %v1944_v27  ;;  %v955_v52 = vsub.f32 %v1858_v57, %v1964_v45 }
 0x21f   : > { %1065 = vst [vmem:[%s1968_s9] sm:$0xff] %v1047_v41  ;;  %v1048_v16 = vadd.f32 %v1954_v29, %v1023_v48  ;;  %v1032_v17 = vmul.f32 %v1940_v14, %v1007_v40  ;;  %v1008_v49 = vmul.f32 %v1359_v43, %v954_v47  ;;  %v910_v50 = vsub.f32 %v874_v35, %v892_v37 }
 0x220   : > { %v927_v53 = vmax.f32 %v909_v44, 0.0  ;;  %v883_v55 = vmul.f32 0.03125, %v860_v46  ;;  %v862_v19 = vpop.xlane.xlu0 %861 }
 0x221   : > { %1066 = vst [vmem:[%s1968_s9 + $0x8] sm:$0xff] %v1048_v16  ;;  %v1057_v58 = vadd.f32 %v1954_v29, %v1032_v17  ;;  %v1033_v59 = vmul.f32 %v1940_v14, %v1008_v49  ;;  %v928_v60 = vmax.f32 %v910_v50, 0.0  ;;  %v884_v61 = vmul.f32 0.03125, %v862_v19 }
 0x222   : > { %v963_v62 = vadd.f32 1e-05, %v927_v53  ;;  %v919_v1 = vsub.f32 %v883_v55, %v901_v18  ;;  %v772_v15 = vpop.xlane.xlu1 %771 }
 0x223   : > { %1075 = vst [vmem:[%s1968_s9 + $0x50] sm:$0xff] %v1057_v58  ;;  %v1058_v3 = vadd.f32 %v1954_v29, %v1033_v59  ;;  %v964_v24 = vadd.f32 1e-05, %v928_v60  ;;  %v920_v25 = vsub.f32 %v884_v61, %v902_v51  ;;  %v1985_v47 = vmul.f32 0.03125, %v772_v15 }
 0x224   : > { %1360 = vrsqrt.f32 %v963_v62  ;;  %v937_v6 = vmax.f32 %v919_v1, 0.0  ;;  %v774_v12 = vpop.xlane.xlu0 %773 }
 0x225   : > { %1076 = vst [vmem:[%s1968_s9 + $0x58] sm:$0xff] %v1058_v3  ;;  %1362 = vrsqrt.f32 %v964_v24  ;;  %v938_v7 = vmax.f32 %v920_v25, 0.0  ;;  %v1983_v21 = vmul.f32 0.03125, %v774_v12  ;;  %v893_v40 = vmul.f32 %v1985_v47, %v1985_v47 }
 0x226   : > { %v973_v9 = vadd.f32 1e-05, %v937_v6 }
 0x227   : > { %v974_v10 = vadd.f32 1e-05, %v938_v7  ;;  %v894_v42 = vmul.f32 %v1983_v21, %v1983_v21 }
 0x228   : > { %1364 = vrsqrt.f32 %v973_v9 }
 0x229   : > { %1366 = vrsqrt.f32 %v974_v10 }
 0x22c   : > { %v794_v20 = vpop.xlane.xlu0 %793 }
 0x22d   : > { %v1993_v34 = vmul.f32 0.03125, %v794_v20 }
 0x22e   : > { %v792_v28 = vpop.xlane.xlu1 %791 }
 0x22f   : > { %v2002_v43 = vmul.f32 0.03125, %v792_v28  ;;  %v904_v57 = vmul.f32 %v1993_v34, %v1993_v34  ;;  %v948_v28 = vsub.f32 %v1875_v0, %v1983_v21 }
 0x230   : > { %v846_v31 = vpop.xlane.xlu0 %845 }
 0x231   : > { %v1361_v36 = vpop.eup %1360  ;;  %v876_v33 = vmul.f32 0.03125, %v846_v31  ;;  %v903_v59 = vmul.f32 %v2002_v43, %v2002_v43 }
 0x232   : > { %v1363_v37 = vpop.eup %1362  ;;  %v999_v39 = vmul.f32 %v1361_v36, %v945_v30  ;;  %v844_v41 = vpop.xlane.xlu1 %843 }
 0x233   : > { %v1000_v48 = vmul.f32 %v1363_v37, %v946_v32  ;;  %v912_v35 = vsub.f32 %v876_v33, %v894_v42  ;;  %v875_v56 = vmul.f32 0.03125, %v844_v41  ;;  %v947_v32 = vsub.f32 %v1872_v63, %v1985_v47 }
 0x234   : > { %v1024_v27 = vmul.f32 %v1940_v14, %v999_v39  ;;  %v866_v44 = vpop.xlane.xlu0 %865 }
 0x235   : > { %v1365_v46 = vpop.eup %1364  ;;  %v1025_v16 = vmul.f32 %v1940_v14, %v1000_v48  ;;  %v930_v17 = vmax.f32 %v912_v35, 0.0  ;;  %v911_v49 = vsub.f32 %v875_v56, %v893_v40  ;;  %v886_v50 = vmul.f32 0.03125, %v866_v44 }
 0x236   : > { %v1367_v51 = vpop.eup %1366  ;;  %v1049_v18 = vadd.f32 %v1954_v29, %v1024_v27  ;;  %v1009_v54 = vmul.f32 %v1365_v46, %v955_v52  ;;  %v864_v38 = vpop.xlane.xlu1 %863  ;;  %v958_v40 = vsub.f32 %v1880_v2, %v1993_v34  ;;  %v957_v27 = vsub.f32 %v1883_v4, %v2002_v43 }
 0x237   : > { %v1050_v45 = vadd.f32 %v1954_v29, %v1025_v16  ;;  %v1010_v53 = vmul.f32 %v1367_v51, %v956_v8  ;;  %v966_v55 = vadd.f32 1e-05, %v930_v17  ;;  %v929_v19 = vmax.f32 %v911_v49, 0.0 }
 0x238   : > { %1067 = vst [vmem:[%s1968_s9 + $0x10] sm:$0xff] %v1049_v18  ;;  %v1034_v58 = vmul.f32 %v1940_v14, %v1009_v54  ;;  %v922_v60 = vsub.f32 %v886_v50, %v904_v57  ;;  %v885_v61 = vmul.f32 0.03125, %v864_v38  ;;  %v778_v12 = vpop.xlane.xlu0 %777 }
 0x239   : > { %1068 = vst [vmem:[%s1968_s9 + $0x18] sm:$0xff] %v1050_v45  ;;  %v1035_v62 = vmul.f32 %v1940_v14, %v1010_v53  ;;  %1368 = vrsqrt.f32 %v966_v55  ;;  %v965_v1 = vadd.f32 1e-05, %v929_v19  ;;  %v2021_v31 = vmul.f32 0.03125, %v778_v12 }
 0x23a   : > { %v1059_v3 = vadd.f32 %v1954_v29, %v1034_v58  ;;  %v940_v24 = vmax.f32 %v922_v60, 0.0  ;;  %v921_v25 = vsub.f32 %v885_v61, %v903_v59  ;;  %v776_v15 = vpop.xlane.xlu1 %775 }
 0x23b   : > { %v1060_v6 = vadd.f32 %v1954_v29, %v1035_v62  ;;  %1370 = vrsqrt.f32 %v965_v1  ;;  %v2025_v33 = vmul.f32 0.03125, %v776_v15  ;;  %v896_v0 = vmul.f32 %v2021_v31, %v2021_v31 }
 0x23c   : > { %1077 = vst [vmem:[%s1968_s9 + $0x60] sm:$0xff] %v1059_v3  ;;  %v976_v7 = vadd.f32 1e-05, %v940_v24  ;;  %v939_v9 = vmax.f32 %v921_v25, 0.0 }
 0x23d   : > { %1078 = vst [vmem:[%s1968_s9 + $0x68] sm:$0xff] %v1060_v6  ;;  %v895_v8 = vmul.f32 %v2025_v33, %v2025_v33 }
 0x23e   : > { %1372 = vrsqrt.f32 %v976_v7  ;;  %v975_v10 = vadd.f32 1e-05, %v939_v9 }
 0x240   : > { %1374 = vrsqrt.f32 %v975_v10 }
 0x244   : > { %v798_v20 = vpop.xlane.xlu0 %797 }
 0x245   : > { %v816_v55 = vmul.f32 0.03125, %v798_v20 }
 0x246   : > { %v1369_v30 = vpop.eup %1368  ;;  %v796_v36 = vpop.xlane.xlu1 %795 }
 0x247   : > { %v1002_v42 = vmul.f32 %v1369_v30, %v948_v28  ;;  %v815_v61 = vmul.f32 0.03125, %v796_v36  ;;  %v906_v6 = vmul.f32 %v816_v55, %v816_v55 }
 0x248   : > { %v1371_v37 = vpop.eup %1370  ;;  %v850_v39 = vpop.xlane.xlu0 %849 }
 0x249   : > { %v1027_v41 = vmul.f32 %v1940_v14, %v1002_v42  ;;  %v1001_v48 = vmul.f32 %v1371_v37, %v947_v32  ;;  %v878_v21 = vmul.f32 0.03125, %v850_v39  ;;  %v905_v12 = vmul.f32 %v815_v61, %v815_v61 }
 0x24a   : > { %v848_v35 = vpop.xlane.xlu1 %847 }
 0x24b   : > { %v1373_v56 = vpop.eup %1372  ;;  %v1052_v63 = vadd.f32 %v1954_v29, %v1027_v41  ;;  %v1026_v47 = vmul.f32 %v1940_v14, %v1001_v48  ;;  %v877_v52 = vmul.f32 0.03125, %v848_v35  ;;  %v914_v2 = vsub.f32 %v878_v21, %v896_v0 }
 0x24c   : > { %v1012_v44 = vmul.f32 %v1373_v56, %v958_v40  ;;  %v782_v34 = vpop.xlane.xlu0 %781  ;;  %v950_v40 = vsub.f32 %v1896_v26, %v2021_v31  ;;  %v949_v21 = vsub.f32 %v1899_v11, %v2025_v33 }
 0x24d   : > { %v1375_v46 = vpop.eup %1374  ;;  %1070 = vst [vmem:[%s1968_s9 + $0x28] sm:$0xff] %v1052_v63  ;;  %v1051_v16 = vadd.f32 %v1954_v29, %v1026_v47  ;;  %v913_v17 = vsub.f32 %v877_v52, %v895_v8  ;;  %v2040_v49 = vmul.f32 0.03125, %v782_v34  ;;  %v932_v18 = vmax.f32 %v914_v2, 0.0 }
 0x24e   : > { %v1037_v50 = vmul.f32 %v1940_v14, %v1012_v44  ;;  %v1011_v51 = vmul.f32 %v1375_v46, %v957_v27  ;;  %v780_v54 = vpop.xlane.xlu1 %779  ;;  %v960_v2 = vsub.f32 %v1904_v13, %v816_v55 }
 0x24f   : > { %1069 = vst [vmem:[%s1968_s9 + $0x20] sm:$0xff] %v1051_v16  ;;  %v931_v57 = vmax.f32 %v913_v17, 0.0  ;;  %v807_v38 = vmul.f32 0.03125, %v780_v54  ;;  %v968_v45 = vadd.f32 1e-05, %v932_v18  ;;  %v898_v58 = vmul.f32 %v2040_v49, %v2040_v49 }
 0x250   : > { %v1062_v4 = vadd.f32 %v1954_v29, %v1037_v50  ;;  %v1036_v43 = vmul.f32 %v1940_v14, %v1011_v51  ;;  %v854_v53 = vpop.xlane.xlu0 %853  ;;  %v952_v44 = vsub.f32 %v1916_v22, %v2040_v49  ;;  %v959_v22 = vsub.f32 %v1907_v5, %v815_v61 }
 0x251   : > { %v967_v19 = vadd.f32 1e-05, %v931_v57  ;;  %v880_v59 = vmul.f32 0.03125, %v854_v53  ;;  %1376 = vrsqrt.f32 %v968_v45  ;;  %v897_v1 = vmul.f32 %v807_v38, %v807_v38 }
 0x252   : > { %1080 = vst [vmem:[%s1968_s9 + $0x78] sm:$0xff] %v1062_v4  ;;  %v1061_v60 = vadd.f32 %v1954_v29, %v1036_v43  ;;  %v852_v62 = vpop.xlane.xlu1 %851  ;;  %v951_v11 = vsub.f32 %v1919_v23, %v807_v38 }
 0x253   : > { %1378 = vrsqrt.f32 %v967_v19  ;;  %v916_v3 = vsub.f32 %v880_v59, %v898_v58  ;;  %v879_v24 = vmul.f32 0.03125, %v852_v62 }
 0x254   : > { %1079 = vst [vmem:[%s1968_s9 + $0x70] sm:$0xff] %v1061_v60  ;;  %v870_v25 = vpop.xlane.xlu0 %869 }
 0x255   : > { %v934_v7 = vmax.f32 %v916_v3, 0.0  ;;  %v915_v9 = vsub.f32 %v879_v24, %v897_v1  ;;  %v888_v10 = vmul.f32 0.03125, %v870_v25 }
 0x256   : > { %v868_v15 = vpop.xlane.xlu1 %867 }
 0x257   : > { %v970_v20 = vadd.f32 1e-05, %v934_v7  ;;  %v933_v28 = vmax.f32 %v915_v9, 0.0  ;;  %v924_v30 = vsub.f32 %v888_v10, %v906_v6  ;;  %v887_v32 = vmul.f32 0.03125, %v868_v15 }
 0x259   : > { %1380 = vrsqrt.f32 %v970_v20  ;;  %v969_v36 = vadd.f32 1e-05, %v933_v28  ;;  %v942_v42 = vmax.f32 %v924_v30, 0.0  ;;  %v923_v37 = vsub.f32 %v887_v32, %v905_v12 }
 0x25b   : > { %1382 = vrsqrt.f32 %v969_v36  ;;  %v978_v39 = vadd.f32 1e-05, %v942_v42  ;;  %v941_v41 = vmax.f32 %v923_v37, 0.0 }
 0x25d   : > { %1384 = vrsqrt.f32 %v978_v39  ;;  %v977_v48 = vadd.f32 1e-05, %v941_v41 }
 0x25e   : > { %v1377_v0 = vpop.eup %1376 }
 0x25f   : > { %1386 = vrsqrt.f32 %v977_v48  ;;  %v1004_v56 = vmul.f32 %v1377_v0, %v950_v40 }
 0x260   : > { %v1379_v35 = vpop.eup %1378 }
 0x261   : > { %v1003_v63 = vmul.f32 %v1379_v35, %v949_v21  ;;  %v1029_v47 = vmul.f32 %v1940_v14, %v1004_v56 }
 0x263   : > { %v1028_v8 = vmul.f32 %v1940_v14, %v1003_v63  ;;  %v1054_v52 = vadd.f32 %v1954_v29, %v1029_v47 }
 0x265   : > { %v1053_v27 = vadd.f32 %v1954_v29, %v1028_v8  ;;  %1072 = vst [vmem:[%s1968_s9 + $0x38] sm:$0xff] %v1054_v52 }
 0x266   : > { %v1381_v26 = vpop.eup %1380 }
 0x267   : > { %1071 = vst [vmem:[%s1968_s9 + $0x30] sm:$0xff] %v1053_v27  ;;  %v1006_v31 = vmul.f32 %v1381_v26, %v952_v44 }
 0x268   : > { %v1383_v33 = vpop.eup %1382 }
 0x269   : > { %v1031_v34 = vmul.f32 %v1940_v14, %v1006_v31  ;;  %v1005_v46 = vmul.f32 %v1383_v33, %v951_v11 }
 0x26a   : > { %v1385_v16 = vpop.eup %1384 }
 0x26b   : > { %v1056_v17 = vadd.f32 %v1954_v29, %v1031_v34  ;;  %v1030_v49 = vmul.f32 %v1940_v14, %v1005_v46  ;;  %v1014_v50 = vmul.f32 %v1385_v16, %v960_v2 }
 0x26c   : > { %v1387_v23 = vpop.eup %1386 }
 0x26d   : > { %1074 = vst [vmem:[%s1968_s9 + $0x48] sm:$0xff] %v1056_v17  ;;  %v1055_v13 = vadd.f32 %v1954_v29, %v1030_v49  ;;  %v1039_v51 = vmul.f32 %v1940_v14, %v1014_v50  ;;  %v1013_v18 = vmul.f32 %v1387_v23, %v959_v22 }
 0x26f   : > { %1073 = vst [vmem:[%s1968_s9 + $0x40] sm:$0xff] %v1055_v13  ;;  %v1064_v5 = vadd.f32 %v1954_v29, %v1039_v51  ;;  %v1038_v54 = vmul.f32 %v1940_v14, %v1013_v18 }
 0x271   : > { %1082 = vst [vmem:[%s1968_s9 + $0x88] sm:$0xff] %v1064_v5  ;;  %v1063_v57 = vadd.f32 %v1954_v29, %v1038_v54 }
 0x273   : > { %1081 = vst [vmem:[%s1968_s9 + $0x80] sm:$0xff] %v1063_v57 }
 0x274   : > { %1401 = shalt.err (!%p1398_p5)
}
 0x275   : > { %s1402_s24 = scalar_lea.hbm %s2080_s14, 2304  ;;  %s1406_s7 = scalar_lea.hbm %s2139_s5, 4608 }
 0x276   : > { %p1403_p6 = scmp.ne.s32.totalorder %s2080_s14, %s1402_s24  ;;  %p1407_p10 = scmp.lt.s32.totalorder %s2080_s14, %s2139_s5 }
 0x277   : > { %p1408_p11 = scmp.lt.s32.totalorder %s1406_s7, %s1402_s24 }
 0x278   : > { %p1404_p7 = pnand %p1403_p6, %p1542_p4 }
 0x279   : > { %p1409_p12 = por %p1408_p11, %p1407_p10 }
 0x27a   : > { %p1405_p9 = pneg %p1404_p7 }
 0x27c   : > { %p1410_p13 = pnand %p1409_p12, %p1405_p9 }
 0x27e   : > { %1413 = shalt.err (!%p1410_p13)
}
 0x27f   : > { %s1470_s10 = smov 128   ;;  %s1471_s12 = smov 8  }
 0x280   : > { %1292 = dma.vmem_to_hbm [thread:$0]  (%p1542_p4), %s2084_s11, 2304, %s2080_s14, %s2089_s21, %s1470_s10, %s1470_s10, %s1471_s12  }
 0x281 PF: > { %p1298_p0 = scmp.ge.s32.totalorder %s1464_s23, 2  ;;  %s1114_s13 = sand.u32 1, %s1444_s18  }
 0x282   : > { %s1115_s15 = scalar_lea.sflag [#allocation3], %s1114_s13 }
 0x283   : > { %p1295_p1 = pnand %p1298_p0, %p1549_p8 }
 0x285   : > { %p1296_p2 = pneg %p1295_p1 }
 0x287   : > { %1439 = dma.done.wait (%p1296_p2), %s1115_s15, 2304  }
 0x288   : > { %1441 = vsyncadd (%p1296_p2), %s1115_s15, 4294964992  ;;  %s18_s23 = sadd.s32 1, %s1464_s23   ;;  %s2142_s18 = smov %s1448_s19 }
 0x289   : > { %p15_p3 = scmp.ge.s32.totalorder %s18_s23, 4   ;;  %s2143_s19 = smov %s1452_s20 }
 0x28a   : > { %s2144_s20 = smov %s1555_s6  ;;  %s2145_s21 = smov %s1460_s22 }
 0x28b   : > { %s2146_s22 = smov %s2148_s26  ;;  %17 = sbr.rel (!%p15_p3) target bundleno = 4 (0x4), region = 76 }
 0x290   :  { %1120 = vsyncpa [#allocation3], 1 }
 0x291   :  { %1122 = vsyncpa [#allocation3 + $0x1], 1 }

// kernel: tpu_custom_call.1
= control target key start
LH: loop header
LB: loop body
LE: loop exit
PB: predicated region body
PF: predicated region fallthrough
CT: control target
= control target key end

     0   :  { %10 = vsyncpa [#allocation3], 0  ;;  %s2636_s0 = inlined_call_operand.vmem [shape: f32[2,10,17,16], index: 0, kind: input, shape index: {}]   ;;  %s2637_s1 = inlined_call_operand.vmem [shape: f32[64,128], index: 1, kind: input, shape index: {}]   ;;  %s2638_s2 = inlined_call_operand.vmem [shape: f32[1,128], index: 2, kind: input, shape index: {}]   ;;  %s2639_s3 = inlined_call_operand.vmem [shape: f32[1,128], index: 3, kind: input, shape index: {}]   ;;  %s2640_s4 = inlined_call_operand.vmem [shape: f32[1,128], index: 4, kind: input, shape index: {}]   ;;  %s2641_s5 = inlined_call_operand.hbm [shape: f32[2,144,128], index: 5, kind: output, shape index: {}]  }
   0x1   :  { %12 = vsyncpa [#allocation3 + $0x1], 0  ;;  %s1997_s18 = smov 0   ;;  %s1999_s19 = smov 0  }
   0x2   :  { %s2001_s20 = smov 0   ;;  %s2003_s21 = smov 0  }
   0x3   :  { %s2005_s22 = smov 0   ;;  %s2007_s23 = smov 0  }
   0x4 LB: > { %s1502_s24 = sadd.s32 4294967295, %s1962_s23   ;;  %s1503_s25 = sadd.s32 4294967294, %s1962_s23   ;;  %s1962_s23 = sphi %s2007_s23, %s18_s23   ;;  %s1958_s22 = sphi %s2005_s22, %s2648_s22   ;;  %s1954_s21 = sphi %s2003_s21, %s2647_s21   ;;  %s1950_s20 = sphi %s2001_s20, %s2646_s20   ;;  %s1946_s19 = sphi %s1999_s19, %s2645_s19   ;;  %s1942_s18 = sphi %s1997_s18, %s2644_s18  }
   0x5   : > { %s30_s26 = sadd.s32 1, %s1958_s22  ;;  %s149_s27 = sadd.s32 1, %s1950_s20 }
   0x6   : > { %p32_p0 = scmp.ge.s32.totalorder %s30_s26, 2  ;;  %p159_p1 = scmp.ne.s32.totalorder %s1950_s20, %s1946_s19 }
   0x7   : > { %p160_p2 = scmp.eq.s32.totalorder %s1502_s24, 1  ;;  %p165_p3 = scmp.ne.s32.totalorder %s1946_s19, %s1942_s18 }
   0x8   : > { %s2650_s26 = smov (%p32_p0, %s30_s26), 0  ;;  %p166_p5 = scmp.eq.s32.totalorder %s1503_s25, 1 }
   0x9   : > { %p2037_p4 = por %p160_p2, %p159_p1  ;;  %s144_s29 = ssub.s32 %s1958_s22, %s2650_s26 }
   0xa   : > { %p1506_p6 = scmp.ge.s32.totalorder %s1962_s23, 1  ;;  %p147_p7 = scmp.eq.s32.totalorder %s144_s29, 0 }
   0xb   : > { %p2044_p8 = por %p166_p5, %p165_p3  ;;  %p204_p9 = scmp.lt.s32.totalorder %s1962_s23, 3 }
   0xc   : > { %s2050_s6 = scalar_select %p147_p7, %s1950_s20, %s149_s27  }
   0xd   : > { %p205_p10 = pnand %p1506_p6, %p204_p9 }
   0xe   : > { %p232_p11 = scmp.lt.s32.totalorder (!%p205_p10), %s1954_s21, 1  ;;  %s1792_s7 = smul.u32 (!%p205_p10), 2304, %s1954_s21 }
   0xf   : > { %208 = sbr.rel (%p205_p10) target bundleno = 512 (0x200), region = 40  ;;  %s1964_s13 = smov (!%p205_p10), [#allocation2]  }
  0x10   : > { %s2582_s11 = scalar_lea.hbm (!%p205_p10), %s2641_s5, %s1792_s7  ;;  %s1890_s14 = sshll.u32 (!%p205_p10), %s1964_s13, 4  ;;  %s1891_s14 = int_to_ptr.vmem [resolvable:$false] %s1890_s14 }
  0x11   : > { %s1892_s16 = scalar_lea.vmem (!%p205_p10), %s1891_s14, 4608 }
  0x14   : > { %v284_v0 = vld [vmem:[%s2637_s1 + $0x18] sm:$0xff]  ;;  %v282_v1 = vld [vmem:[%s2637_s1 + $0x8] sm:$0xff]  ;;  %v283_v2 = vld [vmem:[%s2637_s1 + $0x10] sm:$0xff]  ;;  %s233_s15 = scalar_select %p232_p11, %s1954_s21, 1  ;;  %vm285_vm0 = vcmask 130048  }
  0x15   : > { %1666 = vmatprep.subr.mxu0 %v284_v0  ;;  %1697 = vmatprep.subr.mxu1 %v282_v1  ;;  %v281_v3 = vld [vmem:[%s2637_s1] sm:$0xff]  ;;  %v705_v4 = vld [vmem:[%s2637_s1 + $0x28] sm:$0xff]  ;;  %v886_v5 = vld [vmem:[%s2637_s1 + $0x38] sm:$0xff] }
  0x16   : > { %1667 = vmatpush3.msra.mxu0 %v284_v0  ;;  %1698 = vmatpush3.msra.mxu1 %v282_v1  ;;  %s1791_s27 = smul.u32 240, %s233_s15  ;;  %v704_v12 = vld [vmem:[%s2637_s1 + $0x20] sm:$0xff]  ;;  %v885_v13 = vld [vmem:[%s2637_s1 + $0x30] sm:$0xff]  ;;  %s229_s15 = sand.u32 1, %s1946_s19  }
  0x17   : > { %1668 = vmatprep.subr.mxu0 %v283_v2  ;;  %1699 = vmatprep.subr.mxu1 %v281_v3  ;;  %s1790_s24 = smul.u32 144, %s229_s15  ;;  %s2591_s21 = scalar_lea.sflag [#allocation3], %s229_s15 }
  0x18   : > { %1669 = vmatpush3.msra.mxu0 %v283_v2  ;;  %1700 = vmatpush3.msra.mxu1 %v281_v3  ;;  %s2075_s8 = scalar_lea.vmem %s2636_s0, %s1791_s27 }
  0x19   : > { %1728 = vmatprep.subr.mxu0 %v705_v4  ;;  %1759 = vmatprep.subr.mxu1 %v886_v5  ;;  %v261_v6 = vld [vmem:[%s2075_s8 + $0x1] sm:$0xff]  ;;  %v262_v8 = vld [vmem:[%s2075_s8 + $0x9] sm:$0xff]  ;;  %v2084_v10 = vld [vmem:[%s2075_s8 + $0x19] sm:$0xff]  ;;  %s2459_s29 = scalar_lea.vmem [#allocation2], %s1790_s24 }
  0x1a   : > { %v241_v7 = vld [vmem:[%s2075_s8] sm:$0xff]  ;;  %1670 = vmatprep.mubr.msk.f32.mxu0 %vm285_vm0, %v261_v6  ;;  %v242_v9 = vld [vmem:[%s2075_s8 + $0x8] sm:$0xff]  ;;  %v2087_v11 = vld [vmem:[%s2075_s8 + $0x18] sm:$0xff] }
  0x1b   : > { %1701 = vmatprep.mubr.msk.f32.mxu1 %vm285_vm0, %v241_v7  ;;  %1671 = vmatmul.mubr.msk.f32.vlgmr.msra.gmra.mxu0 %vm285_vm0, %v262_v8  ;;  %v2098_v14 = vld [vmem:[%s2075_s8 + $0x21] sm:$0xff]  ;;  %v2108_v16 = vld [vmem:[%s2075_s8 + $0x31] sm:$0xff]  ;;  %v266_v18 = vld [vmem:[%s2075_s8 + $0x39] sm:$0xff] }
  0x1c   : > { %1702 = vmatmul.mubr.msk.f32.vlgmr.msra.gmra.mxu1 %vm285_vm0, %v242_v9  ;;  %1729 = vmatpush3.msra.mxu0 %v705_v4  ;;  %v2101_v15 = vld [vmem:[%s2075_s8 + $0x20] sm:$0xff]  ;;  %v2111_v17 = vld [vmem:[%s2075_s8 + $0x30] sm:$0xff]  ;;  %v246_v19 = vld [vmem:[%s2075_s8 + $0x38] sm:$0xff] }
  0x1d   : > { %1760 = vmatpush3.msra.mxu1 %v886_v5  ;;  %1673 = vmatprep.mubr.msk.f32.mxu0 %vm285_vm0, %v2084_v10  ;;  %v267_v20 = vld [vmem:[%s2075_s8 + $0x49] sm:$0xff]  ;;  %v268_v22 = vld [vmem:[%s2075_s8 + $0x51] sm:$0xff]  ;;  %v269_v24 = vld [vmem:[%s2075_s8 + $0x61] sm:$0xff] }
  0x1e   : > { %1704 = vmatprep.mubr.msk.f32.mxu1 %vm285_vm0, %v2087_v11  ;;  %1730 = vmatprep.subr.mxu0 %v704_v12  ;;  %v247_v21 = vld [vmem:[%s2075_s8 + $0x48] sm:$0xff]  ;;  %v248_v23 = vld [vmem:[%s2075_s8 + $0x50] sm:$0xff]  ;;  %v249_v25 = vld [vmem:[%s2075_s8 + $0x60] sm:$0xff] }
  0x1f   : > { %1761 = vmatprep.subr.mxu1 %v885_v13  ;;  %1674 = vmatmul.mubr.msk.f32.gmra.mxu0 %vm285_vm0, %v2098_v14  ;;  %v270_v26 = vld [vmem:[%s2075_s8 + $0x69] sm:$0xff]  ;;  %v271_v28 = vld [vmem:[%s2075_s8 + $0x79] sm:$0xff]  ;;  %v272_v30 = vld [vmem:[%s2075_s8 + $0x81] sm:$0xff] }
  0x20   : > { %1705 = vmatmul.mubr.msk.f32.gmra.mxu1 %vm285_vm0, %v2101_v15  ;;  %1676 = vmatprep.mubr.msk.f32.mxu0 %vm285_vm0, %v2108_v16  ;;  %v250_v27 = vld [vmem:[%s2075_s8 + $0x68] sm:$0xff]  ;;  %v251_v29 = vld [vmem:[%s2075_s8 + $0x78] sm:$0xff]  ;;  %v252_v31 = vld [vmem:[%s2075_s8 + $0x80] sm:$0xff] }
  0x21   : > { %1707 = vmatprep.mubr.msk.f32.mxu1 %vm285_vm0, %v2111_v17  ;;  %1731 = vmatpush3.msra.mxu0 %v704_v12  ;;  %v273_v32 = vld [vmem:[%s2075_s8 + $0x91] sm:$0xff]  ;;  %v274_v34 = vld [vmem:[%s2075_s8 + $0x99] sm:$0xff]  ;;  %v275_v36 = vld [vmem:[%s2075_s8 + $0xa9] sm:$0xff] }
  0x22   : > { %1762 = vmatpush3.msra.mxu1 %v885_v13  ;;  %v253_v33 = vld [vmem:[%s2075_s8 + $0x90] sm:$0xff]  ;;  %v254_v35 = vld [vmem:[%s2075_s8 + $0x98] sm:$0xff]  ;;  %v255_v37 = vld [vmem:[%s2075_s8 + $0xa8] sm:$0xff] }
  0x23   : > { %1677 = vmatmul.mubr.msk.f32.gmra.mxu0 %vm285_vm0, %v266_v18  ;;  %v276_v38 = vld [vmem:[%s2075_s8 + $0xb1] sm:$0xff]  ;;  %v277_v40 = vld [vmem:[%s2075_s8 + $0xc1] sm:$0xff]  ;;  %v278_v42 = vld [vmem:[%s2075_s8 + $0xc9] sm:$0xff] }
  0x24   : > { %1708 = vmatmul.mubr.msk.f32.gmra.mxu1 %vm285_vm0, %v246_v19  ;;  %1679 = vmatprep.mubr.msk.f32.mxu0 %vm285_vm0, %v267_v20  ;;  %v256_v39 = vld [vmem:[%s2075_s8 + $0xb0] sm:$0xff]  ;;  %v257_v41 = vld [vmem:[%s2075_s8 + $0xc0] sm:$0xff]  ;;  %v258_v43 = vld [vmem:[%s2075_s8 + $0xc8] sm:$0xff] }
  0x25   : > { %1710 = vmatprep.mubr.msk.f32.mxu1 %vm285_vm0, %v247_v21  ;;  %v259_v44 = vld [vmem:[%s2075_s8 + $0xd8] sm:$0xff]  ;;  %v260_v46 = vld [vmem:[%s2075_s8 + $0xe0] sm:$0xff] }
  0x26   : > { %v279_v45 = vld [vmem:[%s2075_s8 + $0xd9] sm:$0xff]  ;;  %v280_v47 = vld [vmem:[%s2075_s8 + $0xe1] sm:$0xff]  ;;  %s1427_s8 = sshll.u32 %s2459_s29, 4  ;;  %s2586_s8 = int_to_ptr.vmem [resolvable:$true] %s1427_s8 }
  0x27   : > { %1680 = vmatmul.mubr.msk.f32.gmra.mxu0 %vm285_vm0, %v268_v22  ;;  %s1886_s12 = scalar_lea.vmem %s2586_s8, 2304  ;;  %p1893_p1 = scmp.lt.s32.totalorder %s2586_s8, %s1891_s14 }
  0x28   : > { %1711 = vmatmul.mubr.msk.f32.gmra.mxu1 %vm285_vm0, %v248_v23  ;;  %1682 = vmatprep.mubr.msk.f32.mxu0 %vm285_vm0, %v269_v24  ;;  %p1887_p12 = scmp.ne.s32.totalorder %s2586_s8, %s1886_s12  ;;  %p1894_p2 = scmp.lt.s32.totalorder %s1892_s16, %s1886_s12 }
  0x29   : > { %1713 = vmatprep.mubr.msk.f32.mxu1 %vm285_vm0, %v249_v25 }
  0x2a   : > { %p1888_p13 = pnand %p1887_p12, %p2037_p4  ;;  %p1895_p3 = por %p1894_p2, %p1893_p1 }
  0x2b   : > { %1683 = vmatmul.mubr.msk.f32.gmra.mxu0 %vm285_vm0, %v270_v26 }
  0x2c   : > { %1714 = vmatmul.mubr.msk.f32.gmra.mxu1 %vm285_vm0, %v250_v27  ;;  %1685 = vmatprep.mubr.msk.f32.mxu0 %vm285_vm0, %v271_v28  ;;  %p1889_p0 = pneg %p1888_p13 }
  0x2d   : > { %1716 = vmatprep.mubr.msk.f32.mxu1 %vm285_vm0, %v251_v29 }
  0x2e   : > { %p1896_p5 = pnand %p1895_p3, %p1889_p0 }
  0x2f   : > { %1686 = vmatmul.mubr.msk.f32.gmra.mxu0 %vm285_vm0, %v272_v30 }
  0x30   : > { %1717 = vmatmul.mubr.msk.f32.gmra.mxu1 %vm285_vm0, %v252_v31  ;;  %1688 = vmatprep.mubr.msk.f32.mxu0 %vm285_vm0, %v273_v32 }
  0x31   : > { %1719 = vmatprep.mubr.msk.f32.mxu1 %vm285_vm0, %v253_v33 }
  0x33   : > { %1689 = vmatmul.mubr.msk.f32.gmra.mxu0 %vm285_vm0, %v274_v34 }
  0x34   : > { %1720 = vmatmul.mubr.msk.f32.gmra.mxu1 %vm285_vm0, %v254_v35  ;;  %1691 = vmatprep.mubr.msk.f32.mxu0 %vm285_vm0, %v275_v36 }
  0x35   : > { %1722 = vmatprep.mubr.msk.f32.mxu1 %vm285_vm0, %v255_v37 }
  0x37   : > { %1692 = vmatmul.mubr.msk.f32.gmra.mxu0 %vm285_vm0, %v276_v38 }
  0x38   : > { %1723 = vmatmul.mubr.msk.f32.gmra.mxu1 %vm285_vm0, %v256_v39  ;;  %1694 = vmatprep.mubr.msk.f32.mxu0 %vm285_vm0, %v277_v40 }
  0x39   : > { %1725 = vmatprep.mubr.msk.f32.mxu1 %vm285_vm0, %v257_v41 }
  0x3b   : > { %1695 = vmatmul.mubr.msk.f32.gmra.mxu0 %vm285_vm0, %v278_v42 }
  0x3c   : > { %1726 = vmatmul.mubr.msk.f32.gmra.mxu1 %vm285_vm0, %v258_v43  ;;  %1732 = vmatprep.mubr.msk.f32.mxu0 %vm285_vm0, %v2087_v11 }
  0x3d   : > { %1763 = vmatprep.mubr.msk.f32.mxu1 %vm285_vm0, %v2084_v10 }
  0x3f   : > { %1733 = vmatmul.mubr.msk.f32.vlgmr.msra.gmra.mxu0 %vm285_vm0, %v2101_v15 }
  0x40   : > { %1764 = vmatmul.mubr.msk.f32.vlgmr.msra.gmra.mxu1 %vm285_vm0, %v2098_v14  ;;  %1735 = vmatprep.mubr.msk.f32.mxu0 %vm285_vm0, %v2111_v17 }
  0x41   : > { %1766 = vmatprep.mubr.msk.f32.mxu1 %vm285_vm0, %v2108_v16 }
  0x43   : > { %1736 = vmatmul.mubr.msk.f32.gmra.mxu0 %vm285_vm0, %v246_v19 }
  0x44   : > { %1767 = vmatmul.mubr.msk.f32.gmra.mxu1 %vm285_vm0, %v266_v18  ;;  %1738 = vmatprep.mubr.msk.f32.mxu0 %vm285_vm0, %v247_v21 }
  0x45   : > { %1769 = vmatprep.mubr.msk.f32.mxu1 %vm285_vm0, %v267_v20 }
  0x47   : > { %1739 = vmatmul.mubr.msk.f32.gmra.mxu0 %vm285_vm0, %v248_v23 }
  0x48   : > { %1770 = vmatmul.mubr.msk.f32.gmra.mxu1 %vm285_vm0, %v268_v22  ;;  %1741 = vmatprep.mubr.msk.f32.mxu0 %vm285_vm0, %v249_v25 }
  0x49   : > { %1772 = vmatprep.mubr.msk.f32.mxu1 %vm285_vm0, %v269_v24 }
  0x4b   : > { %1742 = vmatmul.mubr.msk.f32.gmra.mxu0 %vm285_vm0, %v250_v27 }
  0x4c   : > { %1773 = vmatmul.mubr.msk.f32.gmra.mxu1 %vm285_vm0, %v270_v26  ;;  %1744 = vmatprep.mubr.msk.f32.mxu0 %vm285_vm0, %v251_v29  ;;  %v2272_v26 = vld [vmem:[%s2638_s2] ss:$0 sm:$0xff] }
  0x4d   : > { %1775 = vmatprep.mubr.msk.f32.mxu1 %vm285_vm0, %v271_v28 }
  0x4f   : > { %1745 = vmatmul.mubr.msk.f32.gmra.mxu0 %vm285_vm0, %v252_v31 }
  0x50   : > { %1776 = vmatmul.mubr.msk.f32.gmra.mxu1 %vm285_vm0, %v272_v30  ;;  %1747 = vmatprep.mubr.msk.f32.mxu0 %vm285_vm0, %v253_v33 }
  0x51   : > { %1778 = vmatprep.mubr.msk.f32.mxu1 %vm285_vm0, %v273_v32 }
  0x53   : > { %1748 = vmatmul.mubr.msk.f32.gmra.mxu0 %vm285_vm0, %v254_v35 }
  0x54   : > { %1779 = vmatmul.mubr.msk.f32.gmra.mxu1 %vm285_vm0, %v274_v34  ;;  %1750 = vmatprep.mubr.msk.f32.mxu0 %vm285_vm0, %v255_v37 }
  0x55   : > { %1781 = vmatprep.mubr.msk.f32.mxu1 %vm285_vm0, %v275_v36 }
  0x57   : > { %1751 = vmatmul.mubr.msk.f32.gmra.mxu0 %vm285_vm0, %v256_v39 }
  0x58   : > { %1782 = vmatmul.mubr.msk.f32.gmra.mxu1 %vm285_vm0, %v276_v38  ;;  %1753 = vmatprep.mubr.msk.f32.mxu0 %vm285_vm0, %v257_v41 }
  0x59   : > { %1784 = vmatprep.mubr.msk.f32.mxu1 %vm285_vm0, %v277_v40 }
  0x5b   : > { %1754 = vmatmul.mubr.msk.f32.gmra.mxu0 %vm285_vm0, %v258_v43 }
  0x5c   : > { %1785 = vmatmul.mubr.msk.f32.gmra.mxu1 %vm285_vm0, %v278_v42  ;;  %1756 = vmatprep.mubr.msk.f32.mxu0 %vm285_vm0, %v259_v44 }
  0x5d   : > { %1787 = vmatprep.mubr.msk.f32.mxu1 %vm285_vm0, %v279_v45 }
  0x5f   : > { %1757 = vmatmul.mubr.msk.f32.gmra.mxu0 %vm285_vm0, %v260_v46 }
  0x60   : > { %1788 = vmatmul.mubr.msk.f32.gmra.mxu1 %vm285_vm0, %v280_v47 }
  0xdb   : > { %v1672_v48 = vpop.f32.mrf.mxu0 }
  0xdc   : > { %v1703_v49 = vpop.f32.mrf.mxu1 }
  0xdd   : > { %v406_v50 = vpop.f32.mrf.mxu0  ;;  %v621_v21 = vadd.f32 %v1703_v49, %v1672_v48 }
  0xde   : > { %v615_v51 = vpop.f32.mrf.mxu1 }
  0xdf   : > { %v1675_v52 = vpop.f32.mrf.mxu0  ;;  %v616_v24 = vadd.f32 %v615_v51, %v406_v50 }
  0xe0   : > { %v1706_v53 = vpop.f32.mrf.mxu1 }
  0xe1   : > { %v416_v54 = vpop.f32.mrf.mxu0  ;;  %v631_v29 = vadd.f32 %v1706_v53, %v1675_v52 }
  0xe2   : > { %v625_v55 = vpop.f32.mrf.mxu1 }
  0xe3   : > { %v2219_v56 = vpop.f32.mrf.mxu0  ;;  %v626_v34 = vadd.f32 %v625_v55, %v416_v54 }
  0xe4   : > { %v2221_v57 = vpop.f32.mrf.mxu1 }
  0xe5   : > { %v426_v58 = vpop.f32.mrf.mxu0  ;;  %v641_v53 = vadd.f32 %v2221_v57, %v2219_v56 }
  0xe6   : > { %v635_v59 = vpop.f32.mrf.mxu1 }
  0xe7   : > { %v2223_v60 = vpop.f32.mrf.mxu0  ;;  %v636_v49 = vadd.f32 %v635_v59, %v426_v58 }
  0xe8   : > { %v2225_v61 = vpop.f32.mrf.mxu1 }
  0xe9   : > { %v2227_v62 = vpop.f32.mrf.mxu0 }
  0xea   : > { %v2229_v63 = vpop.f32.mrf.mxu1 }
  0xeb   : > { %v2231_v0 = vpop.f32.mrf.mxu0 }
  0xec   : > { %v2233_v1 = vpop.f32.mrf.mxu1 }
  0xed   : > { %v2235_v2 = vpop.f32.mrf.mxu0 }
  0xee   : > { %v2237_v3 = vpop.f32.mrf.mxu1 }
  0xef   : > { %v2239_v4 = vpop.f32.mrf.mxu0 }
  0xf0   : > { %v2241_v5 = vpop.f32.mrf.mxu1 }
  0xf1   : > { %v2243_v6 = vpop.f32.mrf.mxu0 }
  0xf2   : > { %v2245_v7 = vpop.f32.mrf.mxu1 }
  0xf3   : > { %v2247_v8 = vpop.f32.mrf.mxu0 }
  0xf4   : > { %v2249_v9 = vpop.f32.mrf.mxu1 }
  0xf5   : > { %v2251_v10 = vpop.f32.mrf.mxu0 }
  0xf6   : > { %v2253_v11 = vpop.f32.mrf.mxu1 }
  0xf7   : > { %v2255_v12 = vpop.f32.mrf.mxu0 }
  0xf8   : > { %v2257_v13 = vpop.f32.mrf.mxu1 }
  0xf9   : > { %v2259_v14 = vpop.f32.mrf.mxu0 }
  0xfa   : > { %v2261_v15 = vpop.f32.mrf.mxu1 }
  0xfb   : > { %v1696_v16 = vpop.f32.mrf.mxu0 }
  0xfc   : > { %v1727_v17 = vpop.f32.mrf.mxu1 }
  0xfd   : > { %v2263_v18 = vadd.f32 %v1727_v17, %v1696_v16  ;;  %v2265_v19 = vpop.f32.mrf.mxu0 }
  0xfe   : > { %v2267_v20 = vpop.f32.mrf.mxu1 }
  0xff   : > { %v1734_v22 = vpop.f32.mrf.mxu0 }
 0x100   : > { %v1765_v23 = vpop.f32.mrf.mxu1  ;;  %v868_v25 = vadd.f32 %v1734_v22, %v621_v21 }
 0x101   : > { %v778_v27 = vpop.f32.mrf.mxu0 }
 0x102   : > { %v959_v28 = vpop.f32.mrf.mxu1  ;;  %v1049_v30 = vadd.f32 %v1765_v23, %v868_v25  ;;  %v867_v31 = vadd.f32 %v778_v27, %v616_v24  ;;  %v646_v25 = vadd.f32 %v2229_v63, %v2227_v62 }
 0x103   : > { %v1737_v32 = vpop.f32.mrf.mxu0 }
 0x104   : > { %v1768_v33 = vpop.f32.mrf.mxu1  ;;  %v2275_v35 = vadd.f32 %v2272_v26, %v1049_v30  ;;  %v1048_v36 = vadd.f32 %v959_v28, %v867_v31  ;;  %v870_v37 = vadd.f32 %v1737_v32, %v631_v29  ;;  %v651_v31 = vadd.f32 %v2225_v61, %v2223_v60 }
 0x105   : > { %v788_v38 = vpop.f32.mrf.mxu0 }
 0x106   : > { %v969_v39 = vpop.f32.mrf.mxu1  ;;  %v869_v40 = vadd.f32 %v788_v38, %v626_v34  ;;  %v1051_v41 = vadd.f32 %v1768_v33, %v870_v37  ;;  %1093 = vadd.xlane.f32.xlu0 %v2275_v35  ;;  %v1146_v42 = vmul.f32 %v2275_v35, %v2275_v35  ;;  %v2281_v45 = vadd.f32 %v2272_v26, %v1048_v36 }
 0x107   : > { %v1740_v43 = vpop.f32.mrf.mxu0 }
 0x108   : > { %v1771_v44 = vpop.f32.mrf.mxu1  ;;  %v1050_v46 = vadd.f32 %v969_v39, %v869_v40  ;;  %1165 = vadd.xlane.f32.xlu1 %v1146_v42  ;;  %v2284_v50 = vadd.f32 %v2272_v26, %v1051_v41  ;;  %v1145_v16 = vmul.f32 %v2281_v45, %v2281_v45  ;;  %v872_v17 = vadd.f32 %v1740_v43, %v641_v53 }
 0x109   : > { %v798_v47 = vpop.f32.mrf.mxu0  ;;  %v656_v41 = vadd.f32 %v2237_v3, %v2235_v2 }
 0x10a   : > { %v979_v48 = vpop.f32.mrf.mxu1  ;;  %1091 = vadd.xlane.f32.xlu0 %v2281_v45  ;;  %v2290_v54 = vadd.f32 %v2272_v26, %v1050_v46  ;;  %v871_v55 = vadd.f32 %v798_v47, %v636_v49  ;;  %v1053_v27 = vadd.f32 %v1771_v44, %v872_v17  ;;  %v1148_v28 = vmul.f32 %v2284_v50, %v2284_v50 }
 0x10b   : > { %v1743_v51 = vpop.f32.mrf.mxu0  ;;  %v661_v47 = vadd.f32 %v2233_v1, %v2231_v0 }
 0x10c   : > { %v1774_v52 = vpop.f32.mrf.mxu1  ;;  %1097 = vadd.xlane.f32.xlu1 %v2284_v50  ;;  %v1052_v23 = vadd.f32 %v979_v48, %v871_v55  ;;  %v1147_v56 = vmul.f32 %v2290_v54, %v2290_v54  ;;  %v2308_v37 = vadd.f32 %v2272_v26, %v1053_v27  ;;  %v874_v62 = vadd.f32 %v1743_v51, %v651_v31 }
 0x10d   : > { %v808_v58 = vpop.f32.mrf.mxu0 }
 0x10e   : > { %v989_v59 = vpop.f32.mrf.mxu1  ;;  %1163 = vadd.xlane.f32.xlu0 %v1145_v16  ;;  %v2305_v32 = vadd.f32 %v2272_v26, %v1052_v23  ;;  %v873_v33 = vadd.f32 %v808_v58, %v646_v25  ;;  %v1055_v42 = vadd.f32 %v1774_v52, %v874_v62  ;;  %v1150_v43 = vmul.f32 %v2308_v37, %v2308_v37 }
 0x10f   : > { %v1746_v21 = vpop.f32.mrf.mxu0  ;;  %v696_v16 = vadd.f32 %v2267_v20, %v2265_v19 }
 0x110   : > { %v1777_v22 = vpop.f32.mrf.mxu1  ;;  %1095 = vadd.xlane.f32.xlu1 %v2290_v54  ;;  %v1054_v39 = vadd.f32 %v989_v59, %v873_v33  ;;  %v1149_v60 = vmul.f32 %v2305_v32, %v2305_v32  ;;  %v2328_v2 = vadd.f32 %v2272_v26, %v1055_v42  ;;  %v876_v3 = vadd.f32 %v1746_v21, %v661_v47 }
 0x111   : > { %v818_v57 = vpop.f32.mrf.mxu0  ;;  %v666_v59 = vadd.f32 %v2245_v7, %v2243_v6 }
 0x112   : > { %v999_v24 = vpop.f32.mrf.mxu1  ;;  %1167 = vadd.xlane.f32.xlu0 %v1147_v56  ;;  %v2325_v48 = vadd.f32 %v2272_v26, %v1054_v39  ;;  %v875_v49 = vadd.f32 %v818_v57, %v656_v41  ;;  %v1057_v23 = vadd.f32 %v1777_v22, %v876_v3  ;;  %v1152_v19 = vmul.f32 %v2328_v2, %v2328_v2 }
 0x113   : > { %v1749_v29 = vpop.f32.mrf.mxu0 }
 0x114   : > { %v1780_v30 = vpop.f32.mrf.mxu1  ;;  %1169 = vadd.xlane.f32.xlu1 %v1148_v28  ;;  %v1056_v58 = vadd.f32 %v999_v24, %v875_v49  ;;  %v1151_v1 = vmul.f32 %v2325_v48, %v2325_v48  ;;  %v2350_v7 = vadd.f32 %v2272_v26, %v1057_v23 }
 0x115   : > { %v828_v34 = vpop.f32.mrf.mxu0 }
 0x116   : > { %v1009_v36 = vpop.f32.mrf.mxu1  ;;  %1099 = vadd.xlane.f32.xlu0 %v2305_v32  ;;  %v2344_v20 = vadd.f32 %v2272_v26, %v1056_v58  ;;  %v877_v24 = vadd.f32 %v828_v34, %v666_v59  ;;  %v1154_v33 = vmul.f32 %v2350_v7, %v2350_v7 }
 0x117   : > { %v1752_v63 = vpop.f32.mrf.mxu0 }
 0x118   : > { %v2311_v38 = vpop.f32.mrf.mxu1  ;;  %1101 = vadd.xlane.f32.xlu1 %v2308_v37  ;;  %v1058_v28 = vadd.f32 %v1009_v36, %v877_v24 }
 0x119   : > { %v838_v61 = vpop.f32.mrf.mxu0 }
 0x11a   : > { %v1019_v40 = vpop.f32.mrf.mxu1  ;;  %1171 = vadd.xlane.f32.xlu0 %v1149_v60  ;;  %v2366_v34 = vadd.f32 %v2272_v26, %v1058_v28 }
 0x11b   : > { %v1755_v44 = vpop.f32.mrf.mxu0 }
 0x11c   : > { %v2320_v46 = vpop.f32.mrf.mxu1  ;;  %1173 = vadd.xlane.f32.xlu1 %v1150_v43 }
 0x11d   : > { %v848_v51 = vpop.f32.mrf.mxu0 }
 0x11e   : > { %v1029_v53 = vpop.f32.mrf.mxu1  ;;  %1103 = vadd.xlane.f32.xlu0 %v2325_v48 }
 0x11f   : > { %v1758_v52 = vpop.f32.mrf.mxu0 }
 0x120   : > { %v1789_v55 = vpop.f32.mrf.mxu1  ;;  %v884_v0 = vadd.f32 %v1758_v52, %v2263_v18  ;;  %1105 = vadd.xlane.f32.xlu1 %v2328_v2  ;;  %v671_v18 = vadd.f32 %v2241_v5, %v2239_v4  ;;  %v1153_v4 = vmul.f32 %v2344_v20, %v2344_v20  ;;  %v676_v5 = vadd.f32 %v2253_v11, %v2251_v10 }
 0x121   : > { %v858_v17 = vpop.f32.mrf.mxu0  ;;  %v1155_v11 = vmul.f32 %v2366_v34, %v2366_v34 }
 0x122   : > { %v1039_v21 = vpop.f32.mrf.mxu1  ;;  %v883_v56 = vadd.f32 %v858_v17, %v696_v16  ;;  %v1065_v57 = vadd.f32 %v1789_v55, %v884_v0  ;;  %1175 = vadd.xlane.f32.xlu0 %v1151_v1  ;;  %v878_v22 = vadd.f32 %v1749_v29, %v671_v18  ;;  %v681_v29 = vadd.f32 %v2249_v9, %v2247_v8 }
 0x123   : > { %v879_v36 = vadd.f32 %v838_v61, %v676_v5  ;;  %v686_v8 = vadd.f32 %v2261_v15, %v2259_v14 }
 0x124   : > { %v2347_v25 = vadd.f32 %v2272_v26, %v1065_v57  ;;  %v1064_v6 = vadd.f32 %v1039_v21, %v883_v56  ;;  %1177 = vadd.xlane.f32.xlu1 %v1152_v19  ;;  %v1059_v31 = vadd.f32 %v1780_v30, %v878_v22  ;;  %v880_v39 = vadd.f32 %v1752_v63, %v681_v29 }
 0x125   : > { %v1060_v10 = vadd.f32 %v1019_v40, %v879_v36  ;;  %v691_v63 = vadd.f32 %v2257_v13, %v2255_v12  ;;  %v881_v61 = vadd.f32 %v848_v51, %v686_v8 }
 0x126   : > { %v2353_v27 = vadd.f32 %v2272_v26, %v1064_v6  ;;  %1107 = vadd.xlane.f32.xlu0 %v2344_v20  ;;  %v2369_v62 = vadd.f32 %v2272_v26, %v1059_v31  ;;  %v1061_v9 = vadd.f32 %v2311_v38, %v880_v39 }
 0x127   : > { %v2383_v60 = vadd.f32 %v2272_v26, %v1060_v10  ;;  %v882_v41 = vadd.f32 %v1755_v44, %v691_v63  ;;  %v1062_v14 = vadd.f32 %v1029_v53, %v881_v61 }
 0x128   : > { %1109 = vadd.xlane.f32.xlu1 %v2350_v7  ;;  %v1156_v30 = vmul.f32 %v2369_v62, %v2369_v62  ;;  %v2386_v40 = vadd.f32 %v2272_v26, %v1061_v9 }
 0x129   : > { %v1157_v15 = vmul.f32 %v2383_v60, %v2383_v60  ;;  %v1063_v38 = vadd.f32 %v2320_v46, %v882_v41  ;;  %v2396_v13 = vadd.f32 %v2272_v26, %v1062_v14  ;;  %v1162_v46 = vmul.f32 %v2347_v25, %v2347_v25 }
 0x12a   : > { %1179 = vadd.xlane.f32.xlu0 %v1153_v4  ;;  %v1158_v12 = vmul.f32 %v2386_v40, %v2386_v40 }
 0x12b   : > { %v2399_v42 = vadd.f32 %v2272_v26, %v1063_v38  ;;  %v1159_v43 = vmul.f32 %v2396_v13, %v2396_v13  ;;  %v1161_v26 = vmul.f32 %v2353_v27, %v2353_v27 }
 0x12c   : > { %1181 = vadd.xlane.f32.xlu1 %v1154_v33 }
 0x12d   : > { %v1160_v44 = vmul.f32 %v2399_v42, %v2399_v42 }
 0x12e   : > { %1111 = vadd.xlane.f32.xlu0 %v2366_v34 }
 0x130   : > { %1113 = vadd.xlane.f32.xlu1 %v2369_v62 }
 0x132   : > { %1183 = vadd.xlane.f32.xlu0 %v1155_v11 }
 0x134   : > { %1185 = vadd.xlane.f32.xlu1 %v1156_v30 }
 0x136   : > { %1115 = vadd.xlane.f32.xlu0 %v2383_v60 }
 0x138   : > { %1117 = vadd.xlane.f32.xlu1 %v2386_v40 }
 0x13a   : > { %1187 = vadd.xlane.f32.xlu0 %v1157_v15 }
 0x13c   : > { %1189 = vadd.xlane.f32.xlu1 %v1158_v12 }
 0x13e   : > { %1119 = vadd.xlane.f32.xlu0 %v2396_v13 }
 0x140   : > { %1121 = vadd.xlane.f32.xlu1 %v2399_v42 }
 0x142   : > { %1191 = vadd.xlane.f32.xlu0 %v1159_v43 }
 0x144   : > { %1193 = vadd.xlane.f32.xlu1 %v1160_v44 }
 0x146   : > { %1123 = vadd.xlane.f32.xlu0 %v2353_v27 }
 0x148   : > { %1125 = vadd.xlane.f32.xlu1 %v2347_v25 }
 0x14a   : > { %1195 = vadd.xlane.f32.xlu0 %v1161_v26 }
 0x14c   : > { %1197 = vadd.xlane.f32.xlu1 %v1162_v46  ;;  %v2438_v46 = vld [vmem:[%s2639_s3] ss:$0 sm:$0xff] }
 0x18f   : > { %v1094_v47 = vpop.xlane.xlu0 %1093 }
 0x190   : > { %v1128_v49 = vmul.f32 0.03125, %v1094_v47 }
 0x191   : > { %v1166_v51 = vpop.xlane.xlu1 %1165 }
 0x192   : > { %v1218_v53 = vmul.f32 %v1128_v49, %v1128_v49  ;;  %v1200_v3 = vmul.f32 0.03125, %v1166_v51  ;;  %v1272_v15 = vsub.f32 %v2275_v35, %v1128_v49  ;;  %v2447_v49 = vld [vmem:[%s2640_s4] ss:$0 sm:$0xff] }
 0x193   : > { %v1092_v52 = vpop.xlane.xlu0 %1091 }
 0x194   : > { %v1236_v55 = vsub.f32 %v1200_v3, %v1218_v53  ;;  %v2413_v16 = vmul.f32 0.03125, %v1092_v52 }
 0x195   : > { %v1098_v58 = vpop.xlane.xlu1 %1097 }
 0x196   : > { %v1254_v0 = vmax.f32 %v1236_v55, 0.0  ;;  %v1217_v17 = vmul.f32 %v2413_v16, %v2413_v16  ;;  %v2417_v56 = vmul.f32 0.03125, %v1098_v58 }
 0x197   : > { %v1164_v1 = vpop.xlane.xlu0 %1163 }
 0x198   : > { %v1290_v59 = vadd.f32 1e-05, %v1254_v0  ;;  %v1199_v21 = vmul.f32 0.03125, %v1164_v1  ;;  %v1220_v4 = vmul.f32 %v2417_v56, %v2417_v56  ;;  %v1271_v1 = vsub.f32 %v2281_v45, %v2413_v16 }
 0x199   : > { %v1096_v23 = vpop.xlane.xlu1 %1095 }
 0x19a   : > { %1850 = vrsqrt.f32 %v1290_v59  ;;  %v1235_v57 = vsub.f32 %v1199_v21, %v1217_v17  ;;  %v2419_v19 = vmul.f32 0.03125, %v1096_v23 }
 0x19b   : > { %v1168_v18 = vpop.xlane.xlu0 %1167 }
 0x19c   : > { %v1253_v24 = vmax.f32 %v1235_v57, 0.0  ;;  %v1219_v6 = vmul.f32 %v2419_v19, %v2419_v19  ;;  %v1201_v22 = vmul.f32 0.03125, %v1168_v18 }
 0x19d   : > { %v1170_v28 = vpop.xlane.xlu1 %1169 }
 0x19e   : > { %v1289_v5 = vadd.f32 1e-05, %v1253_v24  ;;  %v1237_v31 = vsub.f32 %v1201_v22, %v1219_v6  ;;  %v1202_v33 = vmul.f32 0.03125, %v1170_v28 }
 0x19f   : > { %v1100_v29 = vpop.xlane.xlu0 %1099 }
 0x1a0   : > { %1852 = vrsqrt.f32 %v1289_v5  ;;  %v1255_v36 = vmax.f32 %v1237_v31, 0.0  ;;  %v1238_v39 = vsub.f32 %v1202_v33, %v1220_v4  ;;  %v2425_v10 = vmul.f32 0.03125, %v1100_v29 }
 0x1a1   : > { %v1102_v11 = vpop.xlane.xlu1 %1101  ;;  %v1273_v31 = vsub.f32 %v2290_v54, %v2419_v19 }
 0x1a2   : > { %v1291_v8 = vadd.f32 1e-05, %v1255_v36  ;;  %v1256_v9 = vmax.f32 %v1238_v39, 0.0  ;;  %v2427_v30 = vmul.f32 0.03125, %v1102_v11  ;;  %v1221_v41 = vmul.f32 %v2425_v10, %v2425_v10 }
 0x1a3   : > { %v1172_v63 = vpop.xlane.xlu0 %1171  ;;  %v1274_v39 = vsub.f32 %v2284_v50, %v2417_v56 }
 0x1a4   : > { %1854 = vrsqrt.f32 %v1291_v8  ;;  %v1292_v61 = vadd.f32 1e-05, %v1256_v9  ;;  %v1203_v14 = vmul.f32 0.03125, %v1172_v63  ;;  %v1222_v12 = vmul.f32 %v2427_v30, %v2427_v30 }
 0x1a5   : > { %v1174_v38 = vpop.xlane.xlu1 %1173 }
 0x1a6   : > { %1856 = vrsqrt.f32 %v1292_v61  ;;  %v1239_v43 = vsub.f32 %v1203_v14, %v1221_v41  ;;  %v1204_v44 = vmul.f32 0.03125, %v1174_v38 }
 0x1a7   : > { %v1851_v26 = vpop.eup %1850  ;;  %v1104_v47 = vpop.xlane.xlu0 %1103 }
 0x1a8   : > { %v1326_v51 = vmul.f32 %v1851_v26, %v1272_v15  ;;  %v1257_v53 = vmax.f32 %v1239_v43, 0.0  ;;  %v1240_v3 = vsub.f32 %v1204_v44, %v1222_v12  ;;  %v2442_v35 = vmul.f32 0.03125, %v1104_v47 }
 0x1a9   : > { %v1106_v52 = vpop.xlane.xlu1 %1105 }
 0x1aa   : > { %v1351_v55 = vmul.f32 %v2438_v46, %v1326_v51  ;;  %v1293_v58 = vadd.f32 1e-05, %v1257_v53  ;;  %v1258_v0 = vmax.f32 %v1240_v3, 0.0  ;;  %v1223_v59 = vmul.f32 %v2442_v35, %v2442_v35 }
 0x1ab   : > { %v2454_v17 = vmul.f32 0.03125, %v1106_v52  ;;  %v1176_v21 = vpop.xlane.xlu0 %1175 }
 0x1ac   : > { %v1376_v23 = vadd.f32 %v2447_v49, %v1351_v55  ;;  %1858 = vrsqrt.f32 %v1293_v58  ;;  %v1294_v57 = vadd.f32 1e-05, %v1258_v0  ;;  %v1205_v18 = vmul.f32 0.03125, %v1176_v21 }
 0x1ad   : > { %v1853_v24 = vpop.eup %1852  ;;  %v1224_v6 = vmul.f32 %v2454_v17, %v2454_v17  ;;  %v1178_v22 = vpop.xlane.xlu1 %1177  ;;  %v1275_v55 = vsub.f32 %v2305_v32, %v2425_v10 }
 0x1ae   : > { %1394 = vst [vmem:[%s2459_s29 + $0x8] sm:$0xff] %v1376_v23  ;;  %v1325_v45 = vmul.f32 %v1853_v24, %v1271_v1  ;;  %1860 = vrsqrt.f32 %v1294_v57  ;;  %v1241_v16 = vsub.f32 %v1205_v18, %v1223_v59  ;;  %v1206_v28 = vmul.f32 0.03125, %v1178_v22 }
 0x1af   : > { %v1108_v4 = vpop.xlane.xlu0 %1107  ;;  %v1276_v23 = vsub.f32 %v2308_v37, %v2427_v30 }
 0x1b0   : > { %v1350_v5 = vmul.f32 %v2438_v46, %v1325_v45  ;;  %v1259_v33 = vmax.f32 %v1241_v16, 0.0  ;;  %v1242_v29 = vsub.f32 %v1206_v28, %v1224_v6  ;;  %v2467_v11 = vmul.f32 0.03125, %v1108_v4 }
 0x1b1   : > { %v1855_v36 = vpop.eup %1854  ;;  %v1110_v8 = vpop.xlane.xlu1 %1109 }
 0x1b2   : > { %v1375_v9 = vadd.f32 %v2447_v49, %v1350_v5  ;;  %v1327_v63 = vmul.f32 %v1855_v36, %v1273_v31  ;;  %v1295_v61 = vadd.f32 1e-05, %v1259_v33  ;;  %v1260_v41 = vmax.f32 %v1242_v29, 0.0 }
 0x1b3   : > { %v1857_v14 = vpop.eup %1856  ;;  %v2470_v15 = vmul.f32 0.03125, %v1110_v8  ;;  %v1180_v38 = vpop.xlane.xlu0 %1179  ;;  %v1225_v50 = vmul.f32 %v2467_v11, %v2467_v11  ;;  %v1277_v8 = vsub.f32 %v2325_v48, %v2442_v35 }
 0x1b4   : > { %1393 = vst [vmem:[%s2459_s29] sm:$0xff] %v1375_v9  ;;  %v1352_v54 = vmul.f32 %v2438_v46, %v1327_v63  ;;  %v1328_v19 = vmul.f32 %v1857_v14, %v1274_v39  ;;  %1862 = vrsqrt.f32 %v1295_v61  ;;  %v1296_v12 = vadd.f32 1e-05, %v1260_v41 }
 0x1b5   : > { %v1226_v56 = vmul.f32 %v2470_v15, %v2470_v15  ;;  %v1207_v43 = vmul.f32 0.03125, %v1180_v38  ;;  %v1182_v44 = vpop.xlane.xlu1 %1181  ;;  %v1278_v38 = vsub.f32 %v2328_v2, %v2454_v17 }
 0x1b6   : > { %v1377_v26 = vadd.f32 %v2447_v49, %v1352_v54  ;;  %v1353_v47 = vmul.f32 %v2438_v46, %v1328_v19  ;;  %1864 = vrsqrt.f32 %v1296_v12  ;;  %v1208_v51 = vmul.f32 0.03125, %v1182_v44 }
 0x1b7   : > { %v1243_v53 = vsub.f32 %v1207_v43, %v1225_v50  ;;  %v1112_v3 = vpop.xlane.xlu0 %1111 }
 0x1b8   : > { %1395 = vst [vmem:[%s2459_s29 + $0x10] sm:$0xff] %v1377_v26  ;;  %v1378_v52 = vadd.f32 %v2447_v49, %v1353_v47  ;;  %v1244_v58 = vsub.f32 %v1208_v51, %v1226_v56  ;;  %v2484_v0 = vmul.f32 0.03125, %v1112_v3 }
 0x1b9   : > { %v1859_v1 = vpop.eup %1858  ;;  %v1261_v59 = vmax.f32 %v1243_v53, 0.0  ;;  %v1114_v21 = vpop.xlane.xlu1 %1113 }
 0x1ba   : > { %1396 = vst [vmem:[%s2459_s29 + $0x18] sm:$0xff] %v1378_v52  ;;  %v1329_v57 = vmul.f32 %v1859_v1, %v1275_v55  ;;  %v1262_v18 = vmax.f32 %v1244_v58, 0.0  ;;  %v1227_v22 = vmul.f32 %v2484_v0, %v2484_v0  ;;  %v2491_v45 = vmul.f32 0.03125, %v1114_v21 }
 0x1bb   : > { %v1861_v24 = vpop.eup %1860  ;;  %v1297_v6 = vadd.f32 1e-05, %v1261_v59  ;;  %v1184_v32 = vpop.xlane.xlu0 %1183 }
 0x1bc   : > { %v1354_v10 = vmul.f32 %v2438_v46, %v1329_v57  ;;  %v1330_v16 = vmul.f32 %v1861_v24, %v1276_v23  ;;  %v1298_v28 = vadd.f32 1e-05, %v1262_v18  ;;  %v1209_v4 = vmul.f32 0.03125, %v1184_v32 }
 0x1bd   : > { %1866 = vrsqrt.f32 %v1297_v6  ;;  %v1186_v5 = vpop.xlane.xlu1 %1185  ;;  %v1228_v33 = vmul.f32 %v2491_v45, %v2491_v45  ;;  %v1279_v23 = vsub.f32 %v2344_v20, %v2467_v11  ;;  %v1280_v24 = vsub.f32 %v2350_v7, %v2470_v15 }
 0x1be   : > { %v1379_v37 = vadd.f32 %v2447_v49, %v1354_v10  ;;  %v1355_v30 = vmul.f32 %v2438_v46, %v1330_v16  ;;  %1868 = vrsqrt.f32 %v1298_v28  ;;  %v1245_v31 = vsub.f32 %v1209_v4, %v1227_v22 }
 0x1bf   : > { %v1210_v29 = vmul.f32 0.03125, %v1186_v5  ;;  %v1116_v36 = vpop.xlane.xlu0 %1115 }
 0x1c0   : > { %1397 = vst [vmem:[%s2459_s29 + $0x20] sm:$0xff] %v1379_v37  ;;  %v1380_v39 = vadd.f32 %v2447_v49, %v1355_v30  ;;  %v1263_v9 = vmax.f32 %v1245_v31, 0.0  ;;  %v2502_v63 = vmul.f32 0.03125, %v1116_v36  ;;  %v1281_v36 = vsub.f32 %v2366_v34, %v2484_v0 }
 0x1c1   : > { %v1863_v61 = vpop.eup %1862  ;;  %v1246_v41 = vsub.f32 %v1210_v29, %v1228_v33  ;;  %v1118_v14 = vpop.xlane.xlu1 %1117 }
 0x1c2   : > { %1398 = vst [vmem:[%s2459_s29 + $0x28] sm:$0xff] %v1380_v39  ;;  %v1331_v54 = vmul.f32 %v1863_v61, %v1277_v8  ;;  %v1299_v19 = vadd.f32 1e-05, %v1263_v9  ;;  %v1229_v56 = vmul.f32 %v2502_v63, %v2502_v63  ;;  %v2509_v43 = vmul.f32 0.03125, %v1118_v14 }
 0x1c3   : > { %v1865_v12 = vpop.eup %1864  ;;  %v1264_v50 = vmax.f32 %v1246_v41, 0.0  ;;  %v1188_v48 = vpop.xlane.xlu0 %1187 }
 0x1c4   : > { %v1356_v35 = vmul.f32 %v2438_v46, %v1331_v54  ;;  %v1332_v44 = vmul.f32 %v1865_v12, %v1278_v38  ;;  %1870 = vrsqrt.f32 %v1299_v19  ;;  %v1211_v26 = vmul.f32 0.03125, %v1188_v48 }
 0x1c5   : > { %v1300_v47 = vadd.f32 1e-05, %v1264_v50  ;;  %v1230_v2 = vmul.f32 %v2509_v43, %v2509_v43  ;;  %v1190_v17 = vpop.xlane.xlu1 %1189  ;;  %v1282_v50 = vsub.f32 %v2369_v62, %v2491_v45 }
 0x1c6   : > { %v1381_v51 = vadd.f32 %v2447_v49, %v1356_v35  ;;  %v1357_v53 = vmul.f32 %v2438_v46, %v1332_v44  ;;  %v1247_v3 = vsub.f32 %v1211_v26, %v1229_v56  ;;  %v1212_v52 = vmul.f32 0.03125, %v1190_v17 }
 0x1c7   : > { %1872 = vrsqrt.f32 %v1300_v47  ;;  %v1120_v55 = vpop.xlane.xlu0 %1119 }
 0x1c8   : > { %1399 = vst [vmem:[%s2459_s29 + $0x30] sm:$0xff] %v1381_v51  ;;  %v1382_v58 = vadd.f32 %v2447_v49, %v1357_v53  ;;  %v1265_v1 = vmax.f32 %v1247_v3, 0.0  ;;  %v1248_v59 = vsub.f32 %v1212_v52, %v1230_v2  ;;  %v2518_v21 = vmul.f32 0.03125, %v1120_v55 }
 0x1c9   : > { %v1122_v57 = vpop.xlane.xlu1 %1121  ;;  %v1283_v3 = vsub.f32 %v2383_v60, %v2502_v63 }
 0x1ca   : > { %v1867_v18 = vpop.eup %1866  ;;  %1400 = vst [vmem:[%s2459_s29 + $0x38] sm:$0xff] %v1382_v58  ;;  %v1301_v6 = vadd.f32 1e-05, %v1265_v1  ;;  %v1266_v22 = vmax.f32 %v1248_v59, 0.0  ;;  %v1231_v16 = vmul.f32 %v2518_v21, %v2518_v21  ;;  %v2527_v28 = vmul.f32 0.03125, %v1122_v57 }
 0x1cb   : > { %v1869_v32 = vpop.eup %1868  ;;  %v1333_v10 = vmul.f32 %v1867_v18, %v1279_v23  ;;  %v1192_v4 = vpop.xlane.xlu0 %1191  ;;  %v1284_v59 = vsub.f32 %v2386_v40, %v2509_v43  ;;  %v1285_v43 = vsub.f32 %v2396_v13, %v2518_v21 }
 0x1cc   : > { %v1334_v5 = vmul.f32 %v1869_v32, %v1280_v24  ;;  %1874 = vrsqrt.f32 %v1301_v6  ;;  %v1302_v37 = vadd.f32 1e-05, %v1266_v22  ;;  %v1213_v20 = vmul.f32 0.03125, %v1192_v4 }
 0x1cd   : > { %v1358_v11 = vmul.f32 %v2438_v46, %v1333_v10  ;;  %v1232_v7 = vmul.f32 %v2527_v28, %v2527_v28  ;;  %v1194_v15 = vpop.xlane.xlu1 %1193 }
 0x1ce   : > { %v1359_v30 = vmul.f32 %v2438_v46, %v1334_v5  ;;  %1876 = vrsqrt.f32 %v1302_v37  ;;  %v1249_v31 = vsub.f32 %v1213_v20, %v1231_v16  ;;  %v1214_v33 = vmul.f32 0.03125, %v1194_v15 }
 0x1cf   : > { %v1383_v29 = vadd.f32 %v2447_v49, %v1358_v11  ;;  %v1124_v39 = vpop.xlane.xlu0 %1123  ;;  %v1286_v16 = vsub.f32 %v2399_v42, %v2527_v28 }
 0x1d0   : > { %v1384_v8 = vadd.f32 %v2447_v49, %v1359_v30  ;;  %v1267_v9 = vmax.f32 %v1249_v31, 0.0  ;;  %v1250_v61 = vsub.f32 %v1214_v33, %v1232_v7  ;;  %v2537_v41 = vmul.f32 0.03125, %v1124_v39 }
 0x1d1   : > { %v1871_v14 = vpop.eup %1870  ;;  %1401 = vst [vmem:[%s2459_s29 + $0x40] sm:$0xff] %v1383_v29  ;;  %v1126_v38 = vpop.xlane.xlu1 %1125 }
 0x1d2   : > { %1402 = vst [vmem:[%s2459_s29 + $0x48] sm:$0xff] %v1384_v8  ;;  %v1335_v54 = vmul.f32 %v1871_v14, %v1281_v36  ;;  %v1303_v19 = vadd.f32 1e-05, %v1267_v9  ;;  %v1268_v12 = vmax.f32 %v1250_v61, 0.0  ;;  %v1233_v34 = vmul.f32 %v2537_v41, %v2537_v41 }
 0x1d3   : > { %v1144_v0 = vmul.f32 0.03125, %v1126_v38  ;;  %v1196_v56 = vpop.xlane.xlu0 %1195  ;;  %v1287_v21 = vsub.f32 %v2353_v27, %v2537_v41 }
 0x1d4   : > { %v1873_v48 = vpop.eup %1872  ;;  %v1360_v35 = vmul.f32 %v2438_v46, %v1335_v54  ;;  %1878 = vrsqrt.f32 %v1303_v19  ;;  %v1304_v44 = vadd.f32 1e-05, %v1268_v12  ;;  %v1215_v26 = vmul.f32 0.03125, %v1196_v56 }
 0x1d5   : > { %v1336_v47 = vmul.f32 %v1873_v48, %v1282_v50  ;;  %v1234_v2 = vmul.f32 %v1144_v0, %v1144_v0  ;;  %v1198_v17 = vpop.xlane.xlu1 %1197  ;;  %v1288_v42 = vsub.f32 %v2347_v25, %v1144_v0 }
 0x1d6   : > { %v1385_v51 = vadd.f32 %v2447_v49, %v1360_v35  ;;  %1880 = vrsqrt.f32 %v1304_v44  ;;  %v1251_v62 = vsub.f32 %v1215_v26, %v1233_v34  ;;  %v1216_v45 = vmul.f32 0.03125, %v1198_v17 }
 0x1d7   : > { %v1361_v53 = vmul.f32 %v2438_v46, %v1336_v47 }
 0x1d8   : > { %1403 = vst [vmem:[%s2459_s29 + $0x50] sm:$0xff] %v1385_v51  ;;  %v1269_v52 = vmax.f32 %v1251_v62, 0.0  ;;  %v1252_v55 = vsub.f32 %v1216_v45, %v1234_v2 }
 0x1d9   : > { %v1875_v58 = vpop.eup %1874  ;;  %v1386_v1 = vadd.f32 %v2447_v49, %v1361_v53 }
 0x1da   : > { %v1337_v23 = vmul.f32 %v1875_v58, %v1283_v3  ;;  %v1305_v57 = vadd.f32 1e-05, %v1269_v52  ;;  %v1270_v18 = vmax.f32 %v1252_v55, 0.0 }
 0x1db   : > { %v1877_v24 = vpop.eup %1876  ;;  %1404 = vst [vmem:[%s2459_s29 + $0x58] sm:$0xff] %v1386_v1 }
 0x1dc   : > { %v1362_v6 = vmul.f32 %v2438_v46, %v1337_v23  ;;  %v1338_v22 = vmul.f32 %v1877_v24, %v1284_v59  ;;  %1882 = vrsqrt.f32 %v1305_v57  ;;  %v1306_v60 = vadd.f32 1e-05, %v1270_v18 }
 0x1de   : > { %v1387_v63 = vadd.f32 %v2447_v49, %v1362_v6  ;;  %v1363_v32 = vmul.f32 %v2438_v46, %v1338_v22  ;;  %1884 = vrsqrt.f32 %v1306_v60 }
 0x1e0   : > { %1405 = vst [vmem:[%s2459_s29 + $0x60] sm:$0xff] %v1387_v63  ;;  %v1388_v40 = vadd.f32 %v2447_v49, %v1363_v32 }
 0x1e1   : > { %v1879_v10 = vpop.eup %1878 }
 0x1e2   : > { %1406 = vst [vmem:[%s2459_s29 + $0x68] sm:$0xff] %v1388_v40  ;;  %v1339_v4 = vmul.f32 %v1879_v10, %v1285_v43 }
 0x1e3   : > { %v1881_v5 = vpop.eup %1880 }
 0x1e4   : > { %v1364_v37 = vmul.f32 %v2438_v46, %v1339_v4  ;;  %v1340_v20 = vmul.f32 %v1881_v5, %v1286_v16 }
 0x1e6   : > { %v1389_v11 = vadd.f32 %v2447_v49, %v1364_v37  ;;  %v1365_v7 = vmul.f32 %v2438_v46, %v1340_v20 }
 0x1e8   : > { %1407 = vst [vmem:[%s2459_s29 + $0x70] sm:$0xff] %v1389_v11  ;;  %v1390_v13 = vadd.f32 %v2447_v49, %v1365_v7 }
 0x1e9   : > { %v1883_v15 = vpop.eup %1882 }
 0x1ea   : > { %1408 = vst [vmem:[%s2459_s29 + $0x78] sm:$0xff] %v1390_v13  ;;  %v1341_v28 = vmul.f32 %v1883_v15, %v1287_v21 }
 0x1eb   : > { %v1885_v30 = vpop.eup %1884 }
 0x1ec   : > { %v1366_v31 = vmul.f32 %v2438_v46, %v1341_v28  ;;  %v1342_v33 = vmul.f32 %v1885_v30, %v1288_v42 }
 0x1ee   : > { %v1391_v29 = vadd.f32 %v2447_v49, %v1366_v31  ;;  %v1367_v36 = vmul.f32 %v2438_v46, %v1342_v33 }
 0x1f0   : > { %1409 = vst [vmem:[%s2459_s29 + $0x80] sm:$0xff] %v1391_v29  ;;  %v1392_v25 = vadd.f32 %v2447_v49, %v1367_v36 }
 0x1f2   : > { %1410 = vst [vmem:[%s2459_s29 + $0x88] sm:$0xff] %v1392_v25 }
 0x1f3   : > { %1899 = shalt.err (!%p1896_p5)
}
 0x1f4   : > { %s1900_s15 = scalar_lea.hbm %s2582_s11, 2304  ;;  %s1904_s25 = scalar_lea.hbm %s2641_s5, 4608 }
 0x1f5   : > { %p1901_p6 = scmp.ne.s32.totalorder %s2582_s11, %s1900_s15  ;;  %p1905_p10 = scmp.lt.s32.totalorder %s2582_s11, %s2641_s5 }
 0x1f6   : > { %p1906_p11 = scmp.lt.s32.totalorder %s1904_s25, %s1900_s15 }
 0x1f7   : > { %p1902_p7 = pnand %p1901_p6, %p2037_p4 }
 0x1f8   : > { %p1907_p12 = por %p1906_p11, %p1905_p10 }
 0x1f9   : > { %p1903_p9 = pneg %p1902_p7 }
 0x1fb   : > { %p1908_p13 = pnand %p1907_p12, %p1903_p9 }
 0x1fd   : > { %1911 = shalt.err (!%p1908_p13)
}
 0x1fe   : > { %s1965_s7 = smov 128   ;;  %s1966_s9 = smov 8  }
 0x1ff   : > { %1793 = dma.vmem_to_hbm [thread:$0]  (%p2037_p4), %s2586_s8, 2304, %s2582_s11, %s2591_s21, %s1965_s7, %s1965_s7, %s1966_s9  }
 0x200 PF: > { %p1799_p0 = scmp.ge.s32.totalorder %s1962_s23, 2  ;;  %s1442_s10 = sand.u32 1, %s1942_s18  }
 0x201   : > { %s1443_s12 = scalar_lea.sflag [#allocation3], %s1442_s10 }
 0x202   : > { %p1796_p1 = pnand %p1799_p0, %p2044_p8 }
 0x204   : > { %p1797_p2 = pneg %p1796_p1 }
 0x206   : > { %1937 = dma.done.wait (%p1797_p2), %s1443_s12, 2304  }
 0x207   : > { %1939 = vsyncadd (%p1797_p2), %s1443_s12, 4294964992  ;;  %s18_s23 = sadd.s32 1, %s1962_s23   ;;  %s2644_s18 = smov %s1946_s19 }
 0x208   : > { %p15_p3 = scmp.ge.s32.totalorder %s18_s23, 4   ;;  %s2645_s19 = smov %s1950_s20 }
 0x209   : > { %s2646_s20 = smov %s2050_s6  ;;  %s2647_s21 = smov %s1958_s22 }
 0x20a   : > { %s2648_s22 = smov %s2650_s26  ;;  %17 = sbr.rel (!%p15_p3) target bundleno = 4 (0x4), region = 76 }
 0x20f   :  { %1448 = vsyncpa [#allocation3], 1 }
 0x210   :  { %1450 = vsyncpa [#allocation3 + $0x1], 1 }

</bundles_post_ra>
